<compile_context>
chip_gen: v6e
topology: v6e:2x2x1
jax: 0.10.0
libtpu: 0.0.40
codegen_flags: <defaults>
</compile_context>

<pallas_src>
import functools

import jax
import jax.numpy as jnp
from jax import lax
from jax.experimental import pallas as pl
from jax.experimental.pallas import tpu as pltpu

EPS = 1e-6


def _l2_normalize(x, eps=1e-12):
    n = jnp.linalg.norm(x, axis=-1, keepdims=True)
    return x / jnp.maximum(n, eps)


def _vmem_capacity_bytes():
    """Best-effort per-core VMEM capacity query (used only for tile/limit dispatch)."""
    try:
        info = pltpu.get_tpu_info()
        for attr in ("vmem_capacity_bytes", "vmem_size_bytes", "vmem_bytes"):
            v = getattr(info, attr, None)
            if v:
                return int(v)
    except Exception:
        pass
    return 64 << 20  # conservative default (v7x per-TensorCore size)


def _wasserstein_kernel(imgs_ref, capsT_ref, rvec_ref, imask_ref, cvec_ref,
                        cmask_ref, out_ref, *, iters, lamb, tb, tt):
    # Per grid step (M = TB*R padded regions, N = TT*W words):
    #   imgs_ref (M, Dp)  bf16   capsT_ref (Dp, N) bf16
    #   rvec_ref (M, 1)   f32    region marginal (0 on padded regions)
    #   imask_ref(M, 1)   f32    region validity mask
    #   cvec_ref (1, N)   f32    word marginal  (0 on padded words)
    #   cmask_ref(1, N)   f32    word validity mask
    #   out_ref  (TB, TT) f32
    f32, bf16 = jnp.float32, jnp.bfloat16
    M = imgs_ref.shape[0]
    N = capsT_ref.shape[1]
    R = M // tb            # (padded) regions per image
    W = N // tt            # words per caption
    inv_lamb = 1.0 / lamb

    # Grid-invariant 0/1 segment matrices, rebuilt from iotas (cheap VPU work,
    # no HBM DMA / double-buffered VMEM).  bf16 is exact for 0/1 values and
    # keeps every Sinkhorn matmul a single MXU pass.
    wi = lax.broadcasted_iota(jnp.int32, (N, tt), 0)
    cs = lax.broadcasted_iota(jnp.int32, (N, tt), 1) * W
    ew = jnp.where((wi >= cs) & (wi < cs + W), 1.0, 0.0).astype(bf16)      # (N, TT)

    cs_t = lax.broadcasted_iota(jnp.int32, (tt, N), 0) * W
    wi_t = lax.broadcasted_iota(jnp.int32, (tt, N), 1)
    ewt = jnp.where((wi_t >= cs_t) & (wi_t < cs_t + W), 1.0, 0.0).astype(bf16)  # (TT, N)

    is_ = lax.broadcasted_iota(jnp.int32, (tb, M), 0) * R
    ri_ = lax.broadcasted_iota(jnp.int32, (tb, M), 1)
    ert = jnp.where((ri_ >= is_) & (ri_ < is_ + R), 1.0, 0.0).astype(bf16)  # (TB, M)

    # Segmented reductions / broadcasts: bf16 operands, f32 accumulation.
    def sum_w(x):      # (*, N) -> (*, TT): sum over the words of each caption
        return jnp.dot(x.astype(bf16), ew, preferred_element_type=f32)

    def sum_r(x):      # (M, *) -> (TB, *): sum over the regions of each image
        return jnp.dot(ert, x.astype(bf16), preferred_element_type=f32)

    def rep_w(x):      # (*, TT) -> (*, N): repeat per-caption value over its words
        return jnp.dot(x.astype(bf16), ewt, preferred_element_type=f32)

    def rep_r(x):      # (TB, X) -> (M, X): repeat per-image value over its R regions
        # pure VPU sublane broadcast + leading-dim merge (R % 8 == 0 by padding),
        # keeps the tiny K=8 matmul off the serial Sinkhorn critical path.
        X = x.shape[-1]
        return jnp.broadcast_to(x[:, None, :], (tb, R, X)).reshape(M, X)

    # cosine sims: one plain-NN lane-dense bf16 matmul on the MXU, f32 acc.
    s = jnp.dot(imgs_ref[...], capsT_ref[...], preferred_element_type=f32)   # (M, N)

    # P = exp(-(1 - s)/lamb); masked entries have cost +inf  =>  P = 0.
    P = jnp.exp((s - 1.0) * inv_lamb) * imask_ref[...] * cmask_ref[...]

    # normalize total mass per (image, caption) pair: broadcast small->large
    # (rep_w on the (TB, TT) block first -> the expansion matmuls stay tiny).
    tot = sum_w(sum_r(P))                                                  # (TB, TT)
    P = P * rep_r(rep_w(pl.reciprocal(tot + EPS, approx=True)))

    rvec = rvec_ref[...]       # (M, 1)
    cvec = cvec_ref[...]       # (1, N)

    # Sinkhorn-Knopp iterations (statically unrolled, iters is small).
    for _ in range(iters):
        u = sum_w(P) + EPS                                                 # (M, TT)
        P = P * rep_w(rvec * pl.reciprocal(u, approx=True))
        v = sum_r(P) + EPS                                                 # (TB, N)
        P = P * rep_r(cvec * pl.reciprocal(v, approx=True))

    # sims[b, t] = sum_{r, w} fg_sims * P   (masks already folded into P)
    out_ref[...] = sum_w(sum_r(s * P))                                     # (TB, TT)


def wasserstein_pallas(imgs, caps, img_lens, cap_lens, *, iters=3, lamb=0.05,
                       img_tile=8, cap_tile=None, vmem_limit_bytes=None):
    bi, R0, D0 = imgs.shape
    bt, W, _ = caps.shape

    vmem_cap = _vmem_capacity_bytes()
    if cap_tile is None:
        # smaller caption tile on 64 MiB/TC parts (v7x) + more megacore grid steps
        cap_tile = 32 if vmem_cap <= (64 << 20) else 64
    if vmem_limit_bytes is None:
        vmem_limit_bytes = min(max(vmem_cap - (16 << 20), 32 << 20), 100 << 20)

    TB = img_tile
    bi_pad = -(-bi // TB) * TB
    if bt <= cap_tile:                        # captions fit one tile: no padding
        TT, bt_pad = bt, bt
    else:
        TT = cap_tile
        bt_pad = -(-bt // TT) * TT
    n_ct, n_it = bt_pad // TT, bi_pad // TB

    R = -(-R0 // 8) * 8                       # pad regions to a sublane multiple
    Dp = -(-D0 // 128) * 128                  # pad features: fill MXU systolic depth
    M, N = TB * R, TT * W

    # --- grid-invariant precompute (hoisted out of the kernel) ------------------
    imgs_n = _l2_normalize(imgs.astype(jnp.float32))
    caps_n = _l2_normalize(caps.astype(jnp.float32))
    imgs_p = jnp.zeros((bi_pad, R, Dp), jnp.float32).at[:bi, :R0, :D0].set(imgs_n)
    caps_p = jnp.zeros((bt_pad, W, Dp), jnp.float32).at[:bt, :, :D0].set(caps_n)
    il = jnp.ones((bi_pad,), jnp.int32).at[:bi].set(img_lens.astype(jnp.int32))
    cl = jnp.ones((bt_pad,), jnp.int32).at[:bt].set(cap_lens.astype(jnp.int32))

    imask = (jnp.arange(R)[None, :] < il[:, None]).astype(jnp.float32)     # (bi_pad, R)
    cmask = (jnp.arange(W)[None, :] < cl[:, None]).astype(jnp.float32)     # (bt_pad, W)
    rvec = imask / jnp.maximum(il, 1)[:, None].astype(jnp.float32)         # ave-init r
    cvec = cmask / jnp.maximum(cl, 1)[:, None].astype(jnp.float32)         # ave-init c

    # lane-dense bf16 operands; captions pre-transposed to (D, words) so the
    # in-kernel similarity matmul is a plain NN contraction (no per-step XLU).
    imgs2 = imgs_p.astype(jnp.bfloat16).reshape(bi_pad * R, Dp)
    capsT = jnp.transpose(caps_p.astype(jnp.bfloat16).reshape(n_ct, TT, W, Dp),
                          (0, 3, 1, 2)).reshape(n_ct, Dp, N)
    rvec2 = rvec.reshape(bi_pad * R, 1)
    imask2 = imask.reshape(bi_pad * R, 1)
    cvec3 = cvec.reshape(n_ct, 1, N)
    cmask3 = cmask.reshape(n_ct, 1, N)

    # advisory cost estimate (helps XLA schedule the surrounding precompute)
    n_steps = n_ct * n_it
    mm = 2 * M * N
    flops_step = (mm * Dp
                  + iters * (2 * mm * TT + mm * TB)
                  + mm * TB + 4 * TB * TT * N
                  + 10 * M * N)
    trans_step = M * N + iters * (M * TT + TB * N) + TB * TT
    bytes_step = (M * Dp + Dp * N) * 2 + (M + N) * 8 + TB * TT * 4
    try:
        cost = pl.CostEstimate(flops=int(n_steps * flops_step),
                               transcendentals=int(n_steps * trans_step),
                               bytes_accessed=int(n_steps * bytes_step))
    except Exception:
        cost = None

    kernel = functools.partial(_wasserstein_kernel, iters=iters, lamb=lamb,
                               tb=TB, tt=TT)
    out3 = pl.pallas_call(
        kernel,
        out_shape=jax.ShapeDtypeStruct((n_ct, bi_pad, TT), jnp.float32),
        grid_spec=pltpu.PrefetchScalarGridSpec(
            num_scalar_prefetch=0,
            grid=(n_ct, n_it),                    # caption tile outer (stays resident)
            in_specs=[
                pl.BlockSpec((M, Dp), lambda ct, it: (it, 0)),            # image regions
                pl.BlockSpec((None, Dp, N), lambda ct, it: (ct, 0, 0)),   # caps^T tile
                pl.BlockSpec((M, 1), lambda ct, it: (it, 0)),             # r marginal
                pl.BlockSpec((M, 1), lambda ct, it: (it, 0)),             # region mask
                pl.BlockSpec((None, 1, N), lambda ct, it: (ct, 0, 0)),    # c marginal
                pl.BlockSpec((None, 1, N), lambda ct, it: (ct, 0, 0)),    # word mask
            ],
            out_specs=pl.BlockSpec((None, TB, TT), lambda ct, it: (ct, it, 0)),
        ),
        compiler_params=pltpu.CompilerParams(
            dimension_semantics=("parallel", "parallel"),
            vmem_limit_bytes=int(vmem_limit_bytes),
        ),
        cost_estimate=cost,
    )(imgs2, capsT, rvec2, imask2, cvec3, cmask3)

    out = jnp.transpose(out3, (1, 0, 2)).reshape(bi_pad, bt_pad)
    return out[:bi, :bt]


def wasserstein_ref(imgs, caps, img_lens, cap_lens, *, iters=3, lamb=0.05):
    """Pure-JAX mirror of the PyTorch forward (default config), for verification."""
    imgs_n = _l2_normalize(imgs.astype(jnp.float32))
    caps_n = _l2_normalize(caps.astype(jnp.float32))
    fg = jnp.einsum('ird,twd->itrw', imgs_n, caps_n, precision=lax.Precision.HIGHEST)
    max_r = int(img_lens.max())
    max_w = int(cap_lens.max())
    fg = fg[:, :, :max_r, :max_w]
    r_idx = jnp.arange(max_r)
    w_idx = jnp.arange(max_w)
    mask = (r_idx[None, None, :, None] < img_lens[:, None, None, None]) & \
           (w_idx[None, None, None, :] < cap_lens[None, :, None, None])
    maskf = mask.astype(jnp.float32)
    rb = (maskf.sum(-1) != 0).astype(jnp.float32)
    cb = (maskf.sum(-2) != 0).astype(jnp.float32)
    r = rb * (1.0 / rb.sum(-1, keepdims=True))
    c = cb * (1.0 / cb.sum(-1, keepdims=True))
    cost = jnp.where(mask, 1.0 - fg, jnp.inf)
    P = jnp.exp(-cost / lamb)
    P = P / (P.sum(axis=(-2, -1), keepdims=True) + EPS)
    for _ in range(iters):
        u = P.sum(-1) + EPS
        P = P * (r / u)[..., None]
        v = P.sum(-2) + EPS
        P = P * (c / v)[..., None, :]
    return (fg * P * maskf).sum(axis=(-2, -1))


if __name__ == "__main__":
    key = jax.random.PRNGKey(0)
    k1, k2 = jax.random.split(key)
    bi, bt, R, W, D = 2, 4, 16, 12, 32
    imgs = jax.random.normal(k1, (bi, R, D), dtype=jnp.float32)
    caps = jax.random.normal(k2, (bt, W, D), dtype=jnp.float32)
    img_lens = jnp.array([14, 9], dtype=jnp.int32)     # max_r=14 < R, exercises masking
    cap_lens = jnp.array([10, 5, 7, 9], dtype=jnp.int32)

    sims = jax.jit(wasserstein_pallas)(imgs, caps, img_lens, cap_lens)
    jax.block_until_ready(sims)

    ref = wasserstein_ref(imgs, caps, img_lens, cap_lens)
    assert sims.shape == (bi, bt)
    assert bool(jnp.all(jnp.isfinite(sims)))
    # kernel uses bf16 MXU operands (features + Sinkhorn matmuls) and approx EUP
    # reciprocals, so compare against the f32-HIGHEST reference with a relaxed
    # tolerance (bf16 feature quantization is amplified by exp(s/lamb), lamb=0.05).
    assert bool(jnp.allclose(sims, ref, rtol=2.5e-2, atol=5e-3)), (sims, ref)
    print("KERNEL_OK")
</pallas_src>

<mosaic_0001>
module attributes {stable_mosaic.version = 11 : i64} {
  func.func @_wasserstein_kernel(%arg0: i32, %arg1: i32, %arg2: memref<128x128xbf16, #tpu.memory_space<vmem>>, %arg3: memref<1x128x48xbf16, #tpu.memory_space<vmem>>, %arg4: memref<128x1xf32, #tpu.memory_space<vmem>>, %arg5: memref<128x1xf32, #tpu.memory_space<vmem>>, %arg6: memref<1x1x48xf32, #tpu.memory_space<vmem>>, %arg7: memref<1x1x48xf32, #tpu.memory_space<vmem>>, %arg8: memref<1x8x4xf32, #tpu.memory_space<vmem>>) attributes {dimension_semantics = [#tpu.dimension_semantics<parallel>, #tpu.dimension_semantics<parallel>], iteration_bounds = array<i64: 1, 1>, scalar_prefetch = 0 : i64, scratch_operands = 0 : i64, tpu.core_type = #tpu.core_type<tc>, window_params = [{transform_indices = @transform_0, window_bounds = array<i64: 128, 128>}, {transform_indices = @transform_1, window_bounds = array<i64: 1, 128, 48>}, {transform_indices = @transform_2, window_bounds = array<i64: 128, 1>}, {transform_indices = @transform_3, window_bounds = array<i64: 128, 1>}, {transform_indices = @transform_4, window_bounds = array<i64: 1, 1, 48>}, {transform_indices = @transform_5, window_bounds = array<i64: 1, 1, 48>}, {transform_indices = @transform_6, window_bounds = array<i64: 1, 8, 4>}]} {
    %0 = tpu.iota {dimensions = array<i32: 0>} : vector<48x4xi32>
    %1 = tpu.iota {dimensions = array<i32: 1>} : vector<48x4xi32>
    %c12_i32 = arith.constant 12 : i32
    %2 = vector.broadcast %c12_i32 : i32 to vector<48x4xi32>
    %3 = arith.muli %1, %2 : vector<48x4xi32>
    %4 = arith.cmpi sge, %0, %3 : vector<48x4xi32>
    %c12_i32_0 = arith.constant 12 : i32
    %5 = vector.broadcast %c12_i32_0 : i32 to vector<48x4xi32>
    %6 = arith.addi %3, %5 : vector<48x4xi32>
    %7 = arith.cmpi slt, %0, %6 : vector<48x4xi32>
    %8 = arith.andi %4, %7 : vector<48x4xi1>
    %cst = arith.constant 1.000000e+00 : f32
    %cst_1 = arith.constant 0.000000e+00 : f32
    %9 = vector.broadcast %cst : f32 to vector<48x4xf32>
    %10 = vector.broadcast %cst_1 : f32 to vector<48x4xf32>
    %11 = arith.select %8, %9, %10 : vector<48x4xi1>, vector<48x4xf32>
    %12 = arith.truncf %11 : vector<48x4xf32> to vector<48x4xbf16>
    %13 = tpu.iota {dimensions = array<i32: 0>} : vector<4x48xi32>
    %c12_i32_2 = arith.constant 12 : i32
    %14 = vector.broadcast %c12_i32_2 : i32 to vector<4x48xi32>
    %15 = arith.muli %13, %14 : vector<4x48xi32>
    %16 = tpu.iota {dimensions = array<i32: 1>} : vector<4x48xi32>
    %17 = arith.cmpi sge, %16, %15 : vector<4x48xi32>
    %c12_i32_3 = arith.constant 12 : i32
    %18 = vector.broadcast %c12_i32_3 : i32 to vector<4x48xi32>
    %19 = arith.addi %15, %18 : vector<4x48xi32>
    %20 = arith.cmpi slt, %16, %19 : vector<4x48xi32>
    %21 = arith.andi %17, %20 : vector<4x48xi1>
    %cst_4 = arith.constant 1.000000e+00 : f32
    %cst_5 = arith.constant 0.000000e+00 : f32
    %22 = vector.broadcast %cst_4 : f32 to vector<4x48xf32>
    %23 = vector.broadcast %cst_5 : f32 to vector<4x48xf32>
    %24 = arith.select %21, %22, %23 : vector<4x48xi1>, vector<4x48xf32>
    %25 = arith.truncf %24 : vector<4x48xf32> to vector<4x48xbf16>
    %26 = tpu.iota {dimensions = array<i32: 0>} : vector<8x128xi32>
    %c16_i32 = arith.constant 16 : i32
    %27 = vector.broadcast %c16_i32 : i32 to vector<8x128xi32>
    %28 = arith.muli %26, %27 : vector<8x128xi32>
    %29 = tpu.iota {dimensions = array<i32: 1>} : vector<8x128xi32>
    %30 = arith.cmpi sge, %29, %28 : vector<8x128xi32>
    %c16_i32_6 = arith.constant 16 : i32
    %31 = vector.broadcast %c16_i32_6 : i32 to vector<8x128xi32>
    %32 = arith.addi %28, %31 : vector<8x128xi32>
    %33 = arith.cmpi slt, %29, %32 : vector<8x128xi32>
    %34 = arith.andi %30, %33 : vector<8x128xi1>
    %cst_7 = arith.constant 1.000000e+00 : f32
    %cst_8 = arith.constant 0.000000e+00 : f32
    %35 = vector.broadcast %cst_7 : f32 to vector<8x128xf32>
    %36 = vector.broadcast %cst_8 : f32 to vector<8x128xf32>
    %37 = arith.select %34, %35, %36 : vector<8x128xi1>, vector<8x128xf32>
    %38 = arith.truncf %37 : vector<8x128xf32> to vector<8x128xbf16>
    %c0 = arith.constant 0 : index
    %c0_9 = arith.constant 0 : index
    %39 = vector.load %arg2[%c0, %c0_9] : memref<128x128xbf16, #tpu.memory_space<vmem>>, vector<128x128xbf16>
    %c0_10 = arith.constant 0 : index
    %c0_11 = arith.constant 0 : index
    %c0_12 = arith.constant 0 : index
    %40 = vector.load %arg3[%c0_10, %c0_11, %c0_12] : memref<1x128x48xbf16, #tpu.memory_space<vmem>>, vector<1x128x48xbf16>
    %41 = vector.shape_cast %40 : vector<1x128x48xbf16> to vector<128x48xbf16>
    %cst_13 = arith.constant dense<0.000000e+00> : vector<128x48xf32>
    %42 = tpu.matmul %39, %41, %cst_13 {dimension_numbers = #tpu.dot_dimension_numbers<[1], [0], [0], [1], [0, 0, 1, 1], [], []>} : vector<128x128xbf16>, vector<128x48xbf16>, vector<128x48xf32> -> vector<128x48xf32>
    %cst_14 = arith.constant 1.000000e+00 : f32
    %43 = vector.broadcast %cst_14 : f32 to vector<128x48xf32>
    %44 = arith.subf %42, %43 : vector<128x48xf32>
    %cst_15 = arith.constant 2.000000e+01 : f32
    %45 = vector.broadcast %cst_15 : f32 to vector<128x48xf32>
    %46 = arith.mulf %44, %45 : vector<128x48xf32>
    %47 = math.exp %46 : vector<128x48xf32>
    %c0_16 = arith.constant 0 : index
    %c0_17 = arith.constant 0 : index
    %48 = vector.load %arg5[%c0_16, %c0_17] : memref<128x1xf32, #tpu.memory_space<vmem>>, vector<128x1xf32>
    %49 = vector.broadcast %48 : vector<128x1xf32> to vector<128x48xf32>
    %50 = arith.mulf %47, %49 : vector<128x48xf32>
    %c0_18 = arith.constant 0 : index
    %c0_19 = arith.constant 0 : index
    %c0_20 = arith.constant 0 : index
    %51 = vector.load %arg7[%c0_18, %c0_19, %c0_20] : memref<1x1x48xf32, #tpu.memory_space<vmem>>, vector<1x1x48xf32>
    %52 = vector.shape_cast %51 : vector<1x1x48xf32> to vector<1x48xf32>
    %53 = vector.broadcast %52 : vector<1x48xf32> to vector<128x48xf32>
    %54 = arith.mulf %50, %53 : vector<128x48xf32>
    %55 = arith.truncf %54 : vector<128x48xf32> to vector<128x48xbf16>
    %cst_21 = arith.constant dense<0.000000e+00> : vector<8x48xf32>
    %56 = tpu.matmul %38, %55, %cst_21 {dimension_numbers = #tpu.dot_dimension_numbers<[1], [0], [0], [1], [0, 0, 1, 1], [], []>} : vector<8x128xbf16>, vector<128x48xbf16>, vector<8x48xf32> -> vector<8x48xf32>
    %57 = arith.truncf %56 : vector<8x48xf32> to vector<8x48xbf16>
    %cst_22 = arith.constant dense<0.000000e+00> : vector<8x4xf32>
    %58 = tpu.matmul %57, %12, %cst_22 {dimension_numbers = #tpu.dot_dimension_numbers<[1], [0], [0], [1], [0, 0, 1, 1], [], []>} : vector<8x48xbf16>, vector<48x4xbf16>, vector<8x4xf32> -> vector<8x4xf32>
    %cst_23 = arith.constant 9.99999997E-7 : f32
    %59 = vector.broadcast %cst_23 : f32 to vector<8x4xf32>
    %60 = arith.addf %58, %59 : vector<8x4xf32>
    %61 = tpu.reciprocal %60 {approx = true} : vector<8x4xf32> -> vector<8x4xf32>
    %62 = arith.truncf %61 : vector<8x4xf32> to vector<8x4xbf16>
    %cst_24 = arith.constant dense<0.000000e+00> : vector<8x48xf32>
    %63 = tpu.matmul %62, %25, %cst_24 {dimension_numbers = #tpu.dot_dimension_numbers<[1], [0], [0], [1], [0, 0, 1, 1], [], []>} : vector<8x4xbf16>, vector<4x48xbf16>, vector<8x48xf32> -> vector<8x48xf32>
    %64 = vector.shape_cast %63 : vector<8x48xf32> to vector<8x1x48xf32>
    %65 = vector.shape_cast %64 : vector<8x1x48xf32> to vector<8x1x48xf32>
    %66 = vector.broadcast %65 : vector<8x1x48xf32> to vector<8x16x48xf32>
    %67 = vector.shape_cast %66 : vector<8x16x48xf32> to vector<128x48xf32>
    %68 = arith.mulf %54, %67 : vector<128x48xf32>
    %c0_25 = arith.constant 0 : index
    %c0_26 = arith.constant 0 : index
    %69 = vector.load %arg4[%c0_25, %c0_26] : memref<128x1xf32, #tpu.memory_space<vmem>>, vector<128x1xf32>
    %c0_27 = arith.constant 0 : index
    %c0_28 = arith.constant 0 : index
    %c0_29 = arith.constant 0 : index
    %70 = vector.load %arg6[%c0_27, %c0_28, %c0_29] : memref<1x1x48xf32, #tpu.memory_space<vmem>>, vector<1x1x48xf32>
    %71 = vector.shape_cast %70 : vector<1x1x48xf32> to vector<1x48xf32>
    %72 = arith.truncf %68 : vector<128x48xf32> to vector<128x48xbf16>
    %cst_30 = arith.constant dense<0.000000e+00> : vector<128x4xf32>
    %73 = tpu.matmul %72, %12, %cst_30 {dimension_numbers = #tpu.dot_dimension_numbers<[1], [0], [0], [1], [0, 0, 1, 1], [], []>} : vector<128x48xbf16>, vector<48x4xbf16>, vector<128x4xf32> -> vector<128x4xf32>
    %cst_31 = arith.constant 9.99999997E-7 : f32
    %74 = vector.broadcast %cst_31 : f32 to vector<128x4xf32>
    %75 = arith.addf %73, %74 : vector<128x4xf32>
    %76 = tpu.reciprocal %75 {approx = true} : vector<128x4xf32> -> vector<128x4xf32>
    %77 = vector.broadcast %69 : vector<128x1xf32> to vector<128x4xf32>
    %78 = arith.mulf %77, %76 : vector<128x4xf32>
    %79 = arith.truncf %78 : vector<128x4xf32> to vector<128x4xbf16>
    %cst_32 = arith.constant dense<0.000000e+00> : vector<128x48xf32>
    %80 = tpu.matmul %79, %25, %cst_32 {dimension_numbers = #tpu.dot_dimension_numbers<[1], [0], [0], [1], [0, 0, 1, 1], [], []>} : vector<128x4xbf16>, vector<4x48xbf16>, vector<128x48xf32> -> vector<128x48xf32>
    %81 = arith.mulf %68, %80 : vector<128x48xf32>
    %82 = arith.truncf %81 : vector<128x48xf32> to vector<128x48xbf16>
    %cst_33 = arith.constant dense<0.000000e+00> : vector<8x48xf32>
    %83 = tpu.matmul %38, %82, %cst_33 {dimension_numbers = #tpu.dot_dimension_numbers<[1], [0], [0], [1], [0, 0, 1, 1], [], []>} : vector<8x128xbf16>, vector<128x48xbf16>, vector<8x48xf32> -> vector<8x48xf32>
    %cst_34 = arith.constant 9.99999997E-7 : f32
    %84 = vector.broadcast %cst_34 : f32 to vector<8x48xf32>
    %85 = arith.addf %83, %84 : vector<8x48xf32>
    %86 = tpu.reciprocal %85 {approx = true} : vector<8x48xf32> -> vector<8x48xf32>
    %87 = vector.broadcast %71 : vector<1x48xf32> to vector<8x48xf32>
    %88 = arith.mulf %87, %86 : vector<8x48xf32>
    %89 = vector.shape_cast %88 : vector<8x48xf32> to vector<8x1x48xf32>
    %90 = vector.shape_cast %89 : vector<8x1x48xf32> to vector<8x1x48xf32>
    %91 = vector.broadcast %90 : vector<8x1x48xf32> to vector<8x16x48xf32>
    %92 = vector.shape_cast %91 : vector<8x16x48xf32> to vector<128x48xf32>
    %93 = arith.mulf %81, %92 : vector<128x48xf32>
    %94 = arith.truncf %93 : vector<128x48xf32> to vector<128x48xbf16>
    %cst_35 = arith.constant dense<0.000000e+00> : vector<128x4xf32>
    %95 = tpu.matmul %94, %12, %cst_35 {dimension_numbers = #tpu.dot_dimension_numbers<[1], [0], [0], [1], [0, 0, 1, 1], [], []>} : vector<128x48xbf16>, vector<48x4xbf16>, vector<128x4xf32> -> vector<128x4xf32>
    %cst_36 = arith.constant 9.99999997E-7 : f32
    %96 = vector.broadcast %cst_36 : f32 to vector<128x4xf32>
    %97 = arith.addf %95, %96 : vector<128x4xf32>
    %98 = tpu.reciprocal %97 {approx = true} : vector<128x4xf32> -> vector<128x4xf32>
    %99 = vector.broadcast %69 : vector<128x1xf32> to vector<128x4xf32>
    %100 = arith.mulf %99, %98 : vector<128x4xf32>
    %101 = arith.truncf %100 : vector<128x4xf32> to vector<128x4xbf16>
    %cst_37 = arith.constant dense<0.000000e+00> : vector<128x48xf32>
    %102 = tpu.matmul %101, %25, %cst_37 {dimension_numbers = #tpu.dot_dimension_numbers<[1], [0], [0], [1], [0, 0, 1, 1], [], []>} : vector<128x4xbf16>, vector<4x48xbf16>, vector<128x48xf32> -> vector<128x48xf32>
    %103 = arith.mulf %93, %102 : vector<128x48xf32>
    %104 = arith.truncf %103 : vector<128x48xf32> to vector<128x48xbf16>
    %cst_38 = arith.constant dense<0.000000e+00> : vector<8x48xf32>
    %105 = tpu.matmul %38, %104, %cst_38 {dimension_numbers = #tpu.dot_dimension_numbers<[1], [0], [0], [1], [0, 0, 1, 1], [], []>} : vector<8x128xbf16>, vector<128x48xbf16>, vector<8x48xf32> -> vector<8x48xf32>
    %cst_39 = arith.constant 9.99999997E-7 : f32
    %106 = vector.broadcast %cst_39 : f32 to vector<8x48xf32>
    %107 = arith.addf %105, %106 : vector<8x48xf32>
    %108 = tpu.reciprocal %107 {approx = true} : vector<8x48xf32> -> vector<8x48xf32>
    %109 = vector.broadcast %71 : vector<1x48xf32> to vector<8x48xf32>
    %110 = arith.mulf %109, %108 : vector<8x48xf32>
    %111 = vector.shape_cast %110 : vector<8x48xf32> to vector<8x1x48xf32>
    %112 = vector.shape_cast %111 : vector<8x1x48xf32> to vector<8x1x48xf32>
    %113 = vector.broadcast %112 : vector<8x1x48xf32> to vector<8x16x48xf32>
    %114 = vector.shape_cast %113 : vector<8x16x48xf32> to vector<128x48xf32>
    %115 = arith.mulf %103, %114 : vector<128x48xf32>
    %116 = arith.truncf %115 : vector<128x48xf32> to vector<128x48xbf16>
    %cst_40 = arith.constant dense<0.000000e+00> : vector<128x4xf32>
    %117 = tpu.matmul %116, %12, %cst_40 {dimension_numbers = #tpu.dot_dimension_numbers<[1], [0], [0], [1], [0, 0, 1, 1], [], []>} : vector<128x48xbf16>, vector<48x4xbf16>, vector<128x4xf32> -> vector<128x4xf32>
    %cst_41 = arith.constant 9.99999997E-7 : f32
    %118 = vector.broadcast %cst_41 : f32 to vector<128x4xf32>
    %119 = arith.addf %117, %118 : vector<128x4xf32>
    %120 = tpu.reciprocal %119 {approx = true} : vector<128x4xf32> -> vector<128x4xf32>
    %121 = vector.broadcast %69 : vector<128x1xf32> to vector<128x4xf32>
    %122 = arith.mulf %121, %120 : vector<128x4xf32>
    %123 = arith.truncf %122 : vector<128x4xf32> to vector<128x4xbf16>
    %cst_42 = arith.constant dense<0.000000e+00> : vector<128x48xf32>
    %124 = tpu.matmul %123, %25, %cst_42 {dimension_numbers = #tpu.dot_dimension_numbers<[1], [0], [0], [1], [0, 0, 1, 1], [], []>} : vector<128x4xbf16>, vector<4x48xbf16>, vector<128x48xf32> -> vector<128x48xf32>
    %125 = arith.mulf %115, %124 : vector<128x48xf32>
    %126 = arith.truncf %125 : vector<128x48xf32> to vector<128x48xbf16>
    %cst_43 = arith.constant dense<0.000000e+00> : vector<8x48xf32>
    %127 = tpu.matmul %38, %126, %cst_43 {dimension_numbers = #tpu.dot_dimension_numbers<[1], [0], [0], [1], [0, 0, 1, 1], [], []>} : vector<8x128xbf16>, vector<128x48xbf16>, vector<8x48xf32> -> vector<8x48xf32>
    %cst_44 = arith.constant 9.99999997E-7 : f32
    %128 = vector.broadcast %cst_44 : f32 to vector<8x48xf32>
    %129 = arith.addf %127, %128 : vector<8x48xf32>
    %130 = tpu.reciprocal %129 {approx = true} : vector<8x48xf32> -> vector<8x48xf32>
    %131 = vector.broadcast %71 : vector<1x48xf32> to vector<8x48xf32>
    %132 = arith.mulf %131, %130 : vector<8x48xf32>
    %133 = vector.shape_cast %132 : vector<8x48xf32> to vector<8x1x48xf32>
    %134 = vector.shape_cast %133 : vector<8x1x48xf32> to vector<8x1x48xf32>
    %135 = vector.broadcast %134 : vector<8x1x48xf32> to vector<8x16x48xf32>
    %136 = vector.shape_cast %135 : vector<8x16x48xf32> to vector<128x48xf32>
    %137 = arith.mulf %125, %136 : vector<128x48xf32>
    %138 = arith.mulf %42, %137 : vector<128x48xf32>
    %139 = arith.truncf %138 : vector<128x48xf32> to vector<128x48xbf16>
    %cst_45 = arith.constant dense<0.000000e+00> : vector<8x48xf32>
    %140 = tpu.matmul %38, %139, %cst_45 {dimension_numbers = #tpu.dot_dimension_numbers<[1], [0], [0], [1], [0, 0, 1, 1], [], []>} : vector<8x128xbf16>, vector<128x48xbf16>, vector<8x48xf32> -> vector<8x48xf32>
    %141 = arith.truncf %140 : vector<8x48xf32> to vector<8x48xbf16>
    %cst_46 = arith.constant dense<0.000000e+00> : vector<8x4xf32>
    %142 = tpu.matmul %141, %12, %cst_46 {dimension_numbers = #tpu.dot_dimension_numbers<[1], [0], [0], [1], [0, 0, 1, 1], [], []>} : vector<8x48xbf16>, vector<48x4xbf16>, vector<8x4xf32> -> vector<8x4xf32>
    %c0_47 = arith.constant 0 : index
    %c0_48 = arith.constant 0 : index
    %c0_49 = arith.constant 0 : index
    %143 = vector.load %arg8[%c0_47, %c0_48, %c0_49] : memref<1x8x4xf32, #tpu.memory_space<vmem>>, vector<1x8x4xf32>
    %144 = vector.shape_cast %143 : vector<1x8x4xf32> to vector<8x4xf32>
    %145 = vector.shape_cast %142 : vector<8x4xf32> to vector<1x8x4xf32>
    tpu.vector_store %arg8[%c0_47, %c0_48, %c0_49], %145 {strides = array<i32>} : memref<1x8x4xf32, #tpu.memory_space<vmem>>, vector<1x8x4xf32>,
    return
  }
  func.func @transform_0(%arg0: i32, %arg1: i32) -> (i32, i32) {
    %c0_i32 = arith.constant 0 : i32
    %c0_i32_0 = arith.constant 0 : i32
    return %arg1, %c0_i32 : i32, i32
  }
  func.func @transform_1(%arg0: i32, %arg1: i32) -> (i32, i32, i32) {
    %c0_i32 = arith.constant 0 : i32
    %c0_i32_0 = arith.constant 0 : i32
    %c0_i32_1 = arith.constant 0 : i32
    return %arg0, %c0_i32, %c0_i32_0 : i32, i32, i32
  }
  func.func @transform_2(%arg0: i32, %arg1: i32) -> (i32, i32) {
    %c0_i32 = arith.constant 0 : i32
    %c0_i32_0 = arith.constant 0 : i32
    return %arg1, %c0_i32 : i32, i32
  }
  func.func @transform_3(%arg0: i32, %arg1: i32) -> (i32, i32) {
    %c0_i32 = arith.constant 0 : i32
    %c0_i32_0 = arith.constant 0 : i32
    return %arg1, %c0_i32 : i32, i32
  }
  func.func @transform_4(%arg0: i32, %arg1: i32) -> (i32, i32, i32) {
    %c0_i32 = arith.constant 0 : i32
    %c0_i32_0 = arith.constant 0 : i32
    %c0_i32_1 = arith.constant 0 : i32
    return %arg0, %c0_i32, %c0_i32_0 : i32, i32, i32
  }
  func.func @transform_5(%arg0: i32, %arg1: i32) -> (i32, i32, i32) {
    %c0_i32 = arith.constant 0 : i32
    %c0_i32_0 = arith.constant 0 : i32
    %c0_i32_1 = arith.constant 0 : i32
    return %arg0, %c0_i32, %c0_i32_0 : i32, i32, i32
  }
  func.func @transform_6(%arg0: i32, %arg1: i32) -> (i32, i32, i32) {
    %c0_i32 = arith.constant 0 : i32
    %c0_i32_0 = arith.constant 0 : i32
    return %arg0, %arg1, %c0_i32 : i32, i32, i32
  }
}

</mosaic_0001>

<bundles_post_ra>
// kernel: div.13
= control target key start
LH: loop header
LB: loop body
LE: loop exit
PB: predicated region body
PF: predicated region fallthrough
CT: control target
= control target key end

     0   :  { %s37_s0 = inlined_call_operand.vmem [shape: f32[1,1,48], index: 0, kind: input, shape index: {}]   ;;  %s38_s1 = inlined_call_operand.vmem [shape: f32[1,1,48], index: 1, kind: input, shape index: {}]   ;;  %s39_s2 = inlined_call_operand.vmem [shape: f32[1,1,48], index: 2, kind: output, shape index: {}]  }
   0x1   :  { %v4_v0 = vld [vmem:[%s38_s1] sm:$0x1] }
   0x2   :  { %11 = vrcp.f32 %v4_v0  ;;  %v3_v1 = vld [vmem:[%s37_s0] sm:$0x1] }
   0xf   :  { %v12_v2 = vpop.eup %11 }
  0x10   :  { %v8_v3 = vmul.f32 %v12_v2, %v3_v1 }
  0x12   :  { %10 = vst [vmem:[%s39_s2] sm:$0x1] %v8_v3 }

// kernel: div.12
= control target key start
LH: loop header
LB: loop body
LE: loop exit
PB: predicated region body
PF: predicated region fallthrough
CT: control target
= control target key end

     0   :  { %s37_s0 = inlined_call_operand.vmem [shape: f32[128,1], index: 0, kind: input, shape index: {}]   ;;  %s38_s1 = inlined_call_operand.vmem [shape: f32[128,1], index: 1, kind: input, shape index: {}]   ;;  %s39_s2 = inlined_call_operand.vmem [shape: f32[128,1], index: 2, kind: output, shape index: {}]  }
   0x1   :  { %v4_v0 = vld [vmem:[%s38_s1] sm:$0x1] }
   0x2   :  { %11 = vrcp.f32 %v4_v0  ;;  %v3_v1 = vld [vmem:[%s37_s0] sm:$0x1] }
   0xf   :  { %v12_v2 = vpop.eup %11 }
  0x10   :  { %v8_v3 = vmul.f32 %v12_v2, %v3_v1 }
  0x12   :  { %10 = vst [vmem:[%s39_s2] sm:$0x1] %v8_v3 }

// kernel: wasserstein_pallas.1
= control target key start
LH: loop header
LB: loop body
LE: loop exit
PB: predicated region body
PF: predicated region fallthrough
CT: control target
= control target key end

     0   :  { %v3047_v1 = vmov 0   ;;  %v4139_v49 = vmov 0.0   ;;  %v24_v50 = vlaneseq  ;;  %vm3049_vm0 = vmmov 0   ;;  %s4130_s1 = inlined_call_operand.vmem [shape: bf16[1,128,48], index: 1, kind: input, shape index: {}]   ;;  %s4131_s0 = inlined_call_operand.vmem [shape: bf16[128,128], index: 0, kind: input, shape index: {}]   ;;  %s4132_s3 = inlined_call_operand.vmem [shape: f32[128,1], index: 3, kind: input, shape index: {}]   ;;  %s4133_s2 = inlined_call_operand.vmem [shape: f32[128,1], index: 2, kind: input, shape index: {}]   ;;  %s4134_s5 = inlined_call_operand.vmem [shape: f32[1,1,48], index: 5, kind: input, shape index: {}]   ;;  %s4135_s4 = inlined_call_operand.vmem [shape: f32[1,1,48], index: 4, kind: input, shape index: {}]   ;;  %s4136_s6 = inlined_call_operand.vmem [shape: f32[1,8,4], index: 6, kind: output, shape index: {}]  }
   0x1   :  { %v2895_v0 = vld [vmem:[%s4130_s1 + $0x38] sm:$0xff]   ;;  %2893 = vset.pattern.permute.xlu0 %v3047_v1  ;;  %2894 = vset.pattern.permute.xlu1 %v3047_v1  ;;  %v2896_v2 = vld [vmem:[%s4130_s1 + $0x30] sm:$0xff]   ;;  %v2897_v3 = vld [vmem:[%s4130_s1 + $0x28] sm:$0xff]   ;;  %v4137_v60 = vmov 1.0|1.0  }
   0x2   :  { %2607 = vmatprep.subr.bf16.mxu0 %v2895_v0  ;;  %v2898_v4 = vld [vmem:[%s4130_s1 + $0x20] sm:$0xff]   ;;  %v2899_v6 = vld [vmem:[%s4130_s1 + $0x18] sm:$0xff]   ;;  %v2900_v7 = vld [vmem:[%s4130_s1 + $0x10] sm:$0xff]   ;;  %2639 = vmatprep.subr.bf16.mxu1 %v4139_v49  ;;  %v3232_v51 = vand.u32 127, %v24_v50  ;;  %v3236_v52 = vshrl.u32 %v24_v50, 7 }
   0x3   :  { %2608 = vmatpush3.bf16.msra.mxu0 %v2895_v0  ;;  %v2903_v5 = vld [vmem:[%s4131_s0] sm:$0xff]   ;;  %v379_v8 = vld [vmem:[%s4132_s3 + $0x70] sm:$0xff]  ;;  %v380_v10 = vld [vmem:[%s4132_s3 + $0x78] sm:$0xff]  ;;  %2655 = vmatprep.mubr.msk.bf16.mxu1 %vm3049_vm0, %v4139_v49 }
   0x4   :  { %2609 = vmatprep.subr.bf16.mxu0 %v2896_v2  ;;  %2623 = vmatprep.mubr.bf16.mxu0 %v2903_v5  ;;  %v377_v9 = vld [vmem:[%s4132_s3 + $0x60] sm:$0xff]  ;;  %v378_v11 = vld [vmem:[%s4132_s3 + $0x68] sm:$0xff]  ;;  %v375_v13 = vld [vmem:[%s4132_s3 + $0x50] sm:$0xff]  ;;  %v3239_v53 = vmul.u32 12, %v3232_v51  ;;  %v29_v54 = vadd.s32 32, %v3236_v52  ;;  %v30_v55 = vadd.s32 40, %v3236_v52 }
   0x5   :  { %453 = vperm.xlu0 %2893, %v379_v8   ;;  %443 = vperm.xlu1 %2894, %v377_v9   ;;  %v2901_v12 = vld [vmem:[%s4130_s1 + $0x8] sm:$0xff]   ;;  %v376_v14 = vld [vmem:[%s4132_s3 + $0x58] sm:$0xff]  ;;  %v2902_v15 = vld [vmem:[%s4130_s1] sm:$0xff]   ;;  %v27_v57 = vadd.s32 16, %v3236_v52  ;;  %v28_v58 = vadd.s32 24, %v3236_v52 }
   0x6   :  { %v373_v16 = vld [vmem:[%s4132_s3 + $0x40] sm:$0xff]  ;;  %v374_v17 = vld [vmem:[%s4132_s3 + $0x48] sm:$0xff]  ;;  %v371_v19 = vld [vmem:[%s4132_s3 + $0x30] sm:$0xff]  ;;  %v3244_v56 = vadd.s32 12, %v3239_v53  ;;  %vm38_vm1 = vcmp.ge.s32.totalorder %v29_v54, %v3239_v53  ;;  %vm39_vm2 = vcmp.ge.s32.totalorder %v30_v55, %v3239_v53 }
   0x7   :  { %2610 = vmatpush3.bf16.msra.mxu0 %v2896_v2  ;;  %v2904_v18 = vld [vmem:[%s4131_s0 + $0x8] sm:$0xff]   ;;  %v372_v20 = vld [vmem:[%s4132_s3 + $0x38] sm:$0xff]  ;;  %v2905_v21 = vld [vmem:[%s4131_s0 + $0x10] sm:$0xff]   ;;  %vm36_vm6 = vcmp.ge.s32.totalorder %v27_v57, %v3239_v53  ;;  %vm37_vm9 = vcmp.ge.s32.totalorder %v28_v58, %v3239_v53 }
   0x8   :  { %2611 = vmatprep.subr.bf16.mxu0 %v2897_v3  ;;  %v369_v22 = vld [vmem:[%s4132_s3 + $0x20] sm:$0xff]  ;;  %v370_v23 = vld [vmem:[%s4132_s3 + $0x28] sm:$0xff]  ;;  %v2906_v24 = vld [vmem:[%s4131_s0 + $0x18] sm:$0xff]   ;;  %vm45_vm3 = vcmp.lt.s32.totalorder %v29_v54, %v3244_v56  ;;  %vm46_vm4 = vcmp.lt.s32.totalorder %v30_v55, %v3244_v56  ;;  %vm43_vm7 = vcmp.lt.s32.totalorder %v27_v57, %v3244_v56  ;;  %vm44_vm10 = vcmp.lt.s32.totalorder %v28_v58, %v3244_v56 }
   0x9   :  { %458 = vperm.xlu0 %2893, %v380_v10   ;;  %448 = vperm.xlu1 %2894, %v378_v11   ;;  %v367_v25 = vld [vmem:[%s4132_s3 + $0x10] sm:$0xff]  ;;  %v368_v26 = vld [vmem:[%s4132_s3 + $0x18] sm:$0xff]  ;;  %v2907_v27 = vld [vmem:[%s4131_s0 + $0x20] sm:$0xff]  }
   0xa   :  { %v365_v28 = vld [vmem:[%s4132_s3] sm:$0xff]  ;;  %v366_v29 = vld [vmem:[%s4132_s3 + $0x8] sm:$0xff]  ;;  %v2909_v33 = vld [vmem:[%s4131_s0 + $0x30] sm:$0xff]  }
   0xb   :  { %2612 = vmatpush3.bf16.msra.mxu0 %v2897_v3  ;;  %v2908_v30 = vld [vmem:[%s4131_s0 + $0x28] sm:$0xff]   ;;  %v749_v31 = vld [vmem:[%s4133_s2] sm:$0xff]  ;;  %v751_v34 = vld [vmem:[%s4133_s2 + $0x10] sm:$0xff] }
   0xc   :  { %2613 = vmatprep.subr.bf16.mxu0 %v2898_v4  ;;  %v750_v32 = vld [vmem:[%s4133_s2 + $0x8] sm:$0xff]  ;;  %v752_v35 = vld [vmem:[%s4133_s2 + $0x18] sm:$0xff]  ;;  %v753_v37 = vld [vmem:[%s4133_s2 + $0x20] sm:$0xff] }
   0xd   :  { %433 = vperm.xlu0 %2893, %v375_v13   ;;  %438 = vperm.xlu1 %2894, %v376_v14   ;;  %v2910_v36 = vld [vmem:[%s4131_s0 + $0x38] sm:$0xff]   ;;  %v754_v38 = vld [vmem:[%s4133_s2 + $0x28] sm:$0xff]  ;;  %v755_v39 = vld [vmem:[%s4133_s2 + $0x30] sm:$0xff] }
   0xe   :  { %v756_v40 = vld [vmem:[%s4133_s2 + $0x38] sm:$0xff]  ;;  %v757_v41 = vld [vmem:[%s4133_s2 + $0x40] sm:$0xff]  ;;  %v758_v42 = vld [vmem:[%s4133_s2 + $0x48] sm:$0xff] }
   0xf   :  { %2614 = vmatpush3.bf16.msra.mxu0 %v2898_v4  ;;  %v759_v43 = vld [vmem:[%s4133_s2 + $0x50] sm:$0xff]  ;;  %v760_v44 = vld [vmem:[%s4133_s2 + $0x58] sm:$0xff]  ;;  %v761_v45 = vld [vmem:[%s4133_s2 + $0x60] sm:$0xff] }
  0x10   :  { %2615 = vmatprep.subr.bf16.mxu0 %v2899_v6  ;;  %v762_v46 = vld [vmem:[%s4133_s2 + $0x68] sm:$0xff]  ;;  %v763_v47 = vld [vmem:[%s4133_s2 + $0x70] sm:$0xff]  ;;  %v764_v48 = vld [vmem:[%s4133_s2 + $0x78] sm:$0xff] }
  0x11   :  { %423 = vperm.xlu0 %2893, %v373_v16   ;;  %428 = vperm.xlu1 %2894, %v374_v17   ;;  %vm51_vm5 = vmand %vm38_vm1, %vm45_vm3 }
  0x12   :  { %vm52_vm8 = vmand %vm39_vm2, %vm46_vm4  ;;  %vm34_vm4 = vcmp.ge.s32.totalorder %v3236_v52, %v3239_v53 }
  0x13   :  { %2616 = vmatpush3.bf16.msra.mxu0 %v2899_v6  ;;  %vm3256_vm11 = vmpackc.low %vm52_vm8, %vm51_vm5 }
  0x14   :  { %2617 = vmatprep.subr.bf16.mxu0 %v2900_v7  ;;  %vm49_vm12 = vmand %vm36_vm6, %vm43_vm7  ;;  %vm41_vm6 = vcmp.lt.s32.totalorder %v3236_v52, %v3244_v56 }
  0x15   :  { %413 = vperm.xlu0 %2893, %v371_v19   ;;  %418 = vperm.xlu1 %2894, %v372_v20   ;;  %vm50_vm13 = vmand %vm37_vm9, %vm44_vm10 }
  0x16   :  { %vm3266_vm14 = vmpackc.low %vm50_vm13, %vm49_vm12  ;;  %vm549_vm12 = vcmask 392192  }
  0x17   :  { %2618 = vmatpush3.bf16.msra.mxu0 %v2900_v7  ;;  %vm47_vm8 = vmand %vm34_vm4, %vm41_vm6  ;;  %vm595_vm4 = vcmask 31744  }
  0x18   :  { %2619 = vmatprep.subr.bf16.mxu0 %v2901_v12 }
  0x19   :  { %403 = vperm.xlu0 %2893, %v369_v22   ;;  %408 = vperm.xlu1 %2894, %v370_v23  }
  0x1b   :  { %2620 = vmatpush3.bf16.msra.mxu0 %v2901_v12 }
  0x1c   :  { %2621 = vmatprep.subr.bf16.mxu0 %v2902_v15 }
  0x1d   :  { %393 = vperm.xlu0 %2893, %v367_v25   ;;  %398 = vperm.xlu1 %2894, %v368_v26  }
  0x1f   :  { %2622 = vmatpush3.bf16.msra.mxu0 %v2902_v15 }
  0x20   :  { %2675 = vmatprep.subr.msk.bf16.mxu0 %vm3256_vm11, %v4137_v60 }
  0x21   :  { %383 = vperm.xlu0 %2893, %v365_v28   ;;  %388 = vperm.xlu1 %2894, %v366_v29  }
  0x22   :  { %2624 = vmatmul.mubr.bf16.vlgmr.msra.gmra.mxu0 %v2904_v18 }
  0x23   :  { %2627 = vmatprep.mubr.bf16.mxu0 %v2905_v21  ;;  %2676 = vmatpush3.bf16.msk.msra.mxu0 %vm3256_vm11, %v4137_v60 }
  0x24   :  { %2677 = vmatprep.subr.msk.bf16.mxu0 %vm3266_vm14, %v4137_v60 }
  0x25   :  { %913 = vperm.xlu0 %2893, %v749_v31   ;;  %918 = vperm.xlu1 %2894, %v750_v32  }
  0x27   :  { %2678 = vmatpush3.bf16.msk.msra.mxu0 %vm3266_vm14, %v4137_v60 }
  0x29   :  { %923 = vperm.xlu0 %2893, %v751_v34   ;;  %928 = vperm.xlu1 %2894, %v752_v35  }
  0x2a   :  { %2628 = vmatmul.mubr.bf16.gmra.mxu0 %v2906_v24 }
  0x2b   :  { %2631 = vmatprep.mubr.bf16.mxu0 %v2907_v27 }
  0x2d   :  { %933 = vperm.xlu0 %2893, %v753_v37   ;;  %938 = vperm.xlu1 %2894, %v754_v38  }
  0x31   :  { %943 = vperm.xlu0 %2893, %v755_v39   ;;  %948 = vperm.xlu1 %2894, %v756_v40  }
  0x32   :  { %2632 = vmatmul.mubr.bf16.gmra.mxu0 %v2908_v30 }
  0x33   :  { %2635 = vmatprep.mubr.bf16.mxu0 %v2909_v33 }
  0x35   :  { %953 = vperm.xlu0 %2893, %v757_v41   ;;  %958 = vperm.xlu1 %2894, %v758_v42  }
  0x39   :  { %963 = vperm.xlu0 %2893, %v759_v43   ;;  %968 = vperm.xlu1 %2894, %v760_v44  }
  0x3a   :  { %2636 = vmatmul.mubr.bf16.gmra.mxu0 %v2910_v36 }
  0x3d   :  { %973 = vperm.xlu0 %2893, %v761_v45   ;;  %978 = vperm.xlu1 %2894, %v762_v46  }
  0x41   :  { %983 = vperm.xlu0 %2893, %v763_v47   ;;  %988 = vperm.xlu1 %2894, %v764_v48  }
  0x80   :  { %v3312_v23 = vpop.permute.xlu1 %443  ;;  %v454_v30 = vpop.permute.xlu0 %453 }
  0x84   :  { %v449_v40 = vpop.permute.xlu1 %448  ;;  %v459_v44 = vpop.permute.xlu0 %458 }
  0x88   :  { %v439_v55 = vpop.permute.xlu1 %438 }
  0xe2   :  { %v3276_v62 = vpop.f32.mrf.mxu0 }
  0xe3   :  { %4162 = vst [vmem:[#allocation2_spill] sm:$0xff] %v3276_v62  ;;  %v2369_v57 = vadd.f32 -1.0, %v3276_v62 }
  0xe4   :  { %v3278_v63 = vpop.f32.mrf.mxu0 }
  0xe5   :  { %4163 = vst [vmem:[#allocation3_spill] sm:$0xff] %v3278_v63 }
  0xe6   :  { %v3280_v0 = vpop.f32.mrf.mxu0 }
  0xe7   :  { %4164 = vst [vmem:[#allocation4_spill] sm:$0xff] %v3280_v0  ;;  %v2370_v48 = vadd.f32 -1.0, %v3280_v0 }
  0xe8   :  { %v3282_v1 = vpop.f32.mrf.mxu0 }
  0xe9   :  { %4165 = vst [vmem:[#allocation5_spill] sm:$0xff] %v3282_v1 }
  0xea   :  { %v3284_v2 = vpop.f32.mrf.mxu0 }
  0xeb   :  { %4166 = vst [vmem:[#allocation6_spill] sm:$0xff] %v3284_v2  ;;  %v2373_v36 = vadd.f32 -1.0, %v3284_v2 }
  0xec   :  { %v3286_v3 = vpop.f32.mrf.mxu0 }
  0xed   :  { %4167 = vst [vmem:[#allocation7_spill] sm:$0xff] %v3286_v3  ;;  %v2371_v45 = vadd.f32 -1.0, %v3286_v3  ;;  %v323_v46 = vmul.f32 20.0, %v2373_v36 }
  0xee   :  { %v3288_v4 = vpop.f32.mrf.mxu0 }
  0xef   :  { %4168 = vst [vmem:[#allocation8_spill] sm:$0xff] %v3288_v4  ;;  %v2374_v32 = vadd.f32 -1.0, %v3288_v4  ;;  %v321_v58 = vmul.f32 20.0, %v2371_v45 }
  0xf0   :  { %v3290_v5 = vpop.f32.mrf.mxu0 }
  0xf1   :  { %4169 = vst [vmem:[#allocation9_spill] sm:$0xff] %v3290_v5  ;;  %v324_v41 = vmul.f32 20.0, %v2374_v32  ;;  %v2372_v42 = vadd.f32 -1.0, %v3290_v5 }
  0xf2   :  { %v3292_v6 = vpop.f32.mrf.mxu0 }
  0xf3   :  { %4170 = vst [vmem:[#allocation10_spill] sm:$0xff] %v3292_v6  ;;  %v2377_v13 = vadd.f32 -1.0, %v3292_v6  ;;  %v347_v50 = vmul.f32 1.442695, %v324_v41  ;;  %v322_v54 = vmul.f32 20.0, %v2372_v42 }
  0xf4   :  { %v3294_v7 = vpop.f32.mrf.mxu0 }
  0xf5   :  { %4171 = vst [vmem:[#allocation11_spill] sm:$0xff] %v3294_v7  ;;  %v327_v24 = vmul.f32 20.0, %v2377_v13  ;;  %v2375_v25 = vadd.f32 -1.0, %v3294_v7  ;;  %v434_v13 = vpop.permute.xlu0 %433 }
  0xf6   :  { %v3296_v8 = vpop.f32.mrf.mxu0 }
  0xf7   :  { %4172 = vst [vmem:[#allocation12_spill] sm:$0xff] %v3296_v8  ;;  %v2378_v10 = vadd.f32 -1.0, %v3296_v8  ;;  %v353_v37 = vmul.f32 1.442695, %v327_v24  ;;  %v325_v38 = vmul.f32 20.0, %v2375_v25 }
  0xf8   :  { %v3298_v9 = vpop.f32.mrf.mxu0 }
  0xf9   :  { %4173 = vst [vmem:[#allocation13_spill] sm:$0xff] %v3298_v9  ;;  %v328_v17 = vmul.f32 20.0, %v2378_v10  ;;  %v2376_v19 = vadd.f32 -1.0, %v3298_v9  ;;  %v349_v47 = vmul.f32 1.442695, %v325_v38 }
  0xfa   :  { %v3301_v11 = vpop.f32.mrf.mxu0  ;;  %v345_v10 = vmul.f32 1.442695, %v323_v46 }
  0xfb   :  { %4174 = vst [vmem:[#allocation14_spill] sm:$0xff] %v3301_v11  ;;  %v2381_v12 = vadd.f32 -1.0, %v3301_v11  ;;  %v355_v31 = vmul.f32 1.442695, %v328_v17  ;;  %v326_v33 = vmul.f32 20.0, %v2376_v19  ;;  %v319_v19 = vmul.f32 20.0, %v2369_v57 }
  0xfc   :  { %v3305_v14 = vpop.f32.mrf.mxu0  ;;  %v343_v17 = vmul.f32 1.442695, %v322_v54 }
  0xfd   :  { %4175 = vst [vmem:[#allocation15_spill] sm:$0xff] %v3305_v14  ;;  %v331_v15 = vmul.f32 20.0, %v2381_v12  ;;  %v2379_v16 = vadd.f32 -1.0, %v3305_v14  ;;  %v351_v43 = vmul.f32 1.442695, %v326_v33 }
  0xfe   :  { %v3308_v18 = vpop.f32.mrf.mxu0 }
  0xff   :  { %4176 = vst [vmem:[#allocation16_spill] sm:$0xff] %v3308_v18  ;;  %v361_v20 = vmul.f32 1.442695, %v331_v15  ;;  %v329_v21 = vmul.f32 20.0, %v2379_v16  ;;  %v2382_v22 = vadd.f32 -1.0, %v3308_v18  ;;  %v320_v15 = vmul.f32 20.0, %v2370_v48 }
 0x100   :  { %v3315_v26 = vpop.f32.mrf.mxu0  ;;  %v2368_v16 = vadd.f32 -1.0, %v3282_v1 }
 0x101   :  { %4177 = vst [vmem:[#allocation17_spill] sm:$0xff] %v3315_v26  ;;  %2911 = vpow2.f32 %v361_v20  ;;  %v357_v27 = vmul.f32 1.442695, %v329_v21  ;;  %v332_v28 = vmul.f32 20.0, %v2382_v22  ;;  %v2380_v29 = vadd.f32 -1.0, %v3315_v26 }
 0x102   :  { %v2367_v20 = vadd.f32 -1.0, %v3278_v63  ;;  %v341_v21 = vmul.f32 1.442695, %v321_v58 }
 0x103   :  { %v363_v34 = vmul.f32 1.442695, %v332_v28  ;;  %v330_v35 = vmul.f32 20.0, %v2380_v29  ;;  %2913 = vpow2.f32 %v357_v27  ;;  %v429_v27 = vpop.permute.xlu1 %428  ;;  %v339_v28 = vmul.f32 1.442695, %v320_v15 }
 0x104   :  { %v317_v36 = vmul.f32 20.0, %v2367_v20 }
 0x105   :  { %2915 = vpow2.f32 %v363_v34  ;;  %v359_v39 = vmul.f32 1.442695, %v330_v35  ;;  %v424_v34 = vpop.permute.xlu0 %423  ;;  %v337_v35 = vmul.f32 1.442695, %v319_v19 }
 0x106   :  { %2917 = vpow2.f32 %v355_v31  ;;  %v318_v31 = vmul.f32 20.0, %v2368_v16 }
 0x107   :  { %2919 = vpow2.f32 %v359_v39  ;;  %v419_v48 = vpop.permute.xlu1 %418 }
 0x108   :  { %2921 = vpow2.f32 %v353_v37  ;;  %v3329_v37 = vld [vmem:[%s4134_s5] ss:$0 sm:$0xff] }
 0x109   :  { %2923 = vpow2.f32 %v351_v43  ;;  %v335_v43 = vmul.f32 1.442695, %v318_v31  ;;  %v414_v57 = vpop.permute.xlu0 %413 }
 0x10a   :  { %2925 = vpow2.f32 %v349_v47 }
 0x10b   :  { %2927 = vpow2.f32 %v347_v50  ;;  %v333_v50 = vmul.f32 1.442695, %v317_v36 }
 0x10c   :  { %2929 = vpow2.f32 %v345_v10 }
 0x10d   :  { %2931 = vpow2.f32 %v343_v17  ;;  %v409_v17 = vpop.permute.xlu1 %408 }
 0x10e   :  { %v2912_v12 = vpop.eup %2911  ;;  %2933 = vpow2.f32 %v341_v21 }
 0x10f   :  { %v475_v24 = vmul.f32 %v2912_v12, %v454_v30  ;;  %2935 = vpow2.f32 %v339_v28 }
 0x110   :  { %v2914_v22 = vpop.eup %2913  ;;  %2937 = vpow2.f32 %v337_v35 }
 0x111   :  { %v3332_v38 = vmul.f32 %v3329_v37, %v475_v24  ;;  %v473_v39 = vmul.f32 %v2914_v22, %v3312_v23  ;;  %2939 = vpow2.f32 %v335_v43  ;;  %v404_v24 = vpop.permute.xlu0 %403 }
 0x112   :  { %v2916_v25 = vpop.eup %2915  ;;  %2941 = vpow2.f32 %v333_v50 }
 0x113   :  { %v2918_v29 = vpop.eup %2917  ;;  %v476_v32 = vmul.f32 %v2916_v25, %v459_v44  ;;  %v3344_v54 = vmul.f32 %v3329_v37, %v473_v39 }
 0x114   :  { %v2920_v33 = vpop.eup %2919  ;;  %v472_v46 = vmul.f32 %v2918_v29, %v439_v55 }
 0x115   :  { %v3335_v30 = vmul.f32 %v3329_v37, %v476_v32  ;;  %v474_v41 = vmul.f32 %v2920_v33, %v449_v40  ;;  %v2922_v42 = vpop.eup %2921 }
 0x116   :  { %v2924_v47 = vpop.eup %2923  ;;  %v471_v23 = vmul.f32 %v2922_v42, %v434_v13  ;;  %v3350_v10 = vmul.f32 %v3329_v37, %v472_v46  ;;  %v69_v46 = vmul.u32 16, %v3236_v52 }
 0x117   :  { %v507_v44 = vpack.c.bf16 %v3335_v30, %v3332_v38  ;;  %v3341_v45 = vmul.f32 %v3329_v37, %v474_v41  ;;  %v2926_v40 = vpop.eup %2925  ;;  %v470_v55 = vmul.f32 %v2924_v47, %v429_v27  ;;  %v394_v41 = vpop.permute.xlu0 %393 }
 0x118   :  { %v2928_v12 = vpop.eup %2927  ;;  %v3353_v15 = vmul.f32 %v3329_v37, %v471_v23  ;;  %v469_v16 = vmul.f32 %v2926_v40, %v424_v34  ;;  %v399_v34 = vpop.permute.xlu1 %398  ;;  %vm70_vm15 = vcmp.ge.s32.totalorder %v3232_v51, %v69_v46 }
 0x119   :  { %2640 = vmatpush3.bf16.msra.mxu1 %v507_v44  ;;  %v506_v58 = vpack.c.bf16 %v3341_v45, %v3344_v54  ;;  %v2930_v13 = vpop.eup %2929  ;;  %v3359_v20 = vmul.f32 %v3329_v37, %v470_v55  ;;  %v468_v21 = vmul.f32 %v2928_v12, %v419_v48  ;;  %v71_v12 = vadd.s32 16, %v69_v46 }
 0x11a   :  { %2641 = vmatprep.subr.bf16.mxu1 %v4139_v49  ;;  %v505_v19 = vpack.c.bf16 %v3350_v10, %v3353_v15  ;;  %v2932_v22 = vpop.eup %2931  ;;  %v3362_v27 = vmul.f32 %v3329_v37, %v469_v16  ;;  %v467_v28 = vmul.f32 %v2930_v13, %v414_v57 }
 0x11b   :  { %v2934_v25 = vpop.eup %2933  ;;  %v3368_v32 = vmul.f32 %v3329_v37, %v468_v21  ;;  %v466_v33 = vmul.f32 %v2932_v22, %v409_v17  ;;  %v384_v16 = vpop.permute.xlu0 %383  ;;  %vm72_vm1 = vcmp.lt.s32.totalorder %v3232_v51, %v71_v12 }
 0x11c   :  { %v2936_v29 = vpop.eup %2935  ;;  %v504_v31 = vpack.c.bf16 %v3359_v20, %v3362_v27  ;;  %v3371_v35 = vmul.f32 %v3329_v37, %v467_v28  ;;  %v465_v36 = vmul.f32 %v2934_v25, %v404_v24  ;;  %v389_v40 = vpop.permute.xlu1 %388  ;;  %vm73_vm2 = vmand %vm70_vm15, %vm72_vm1  ;;  %v4180_v28 = vmov 0 }
 0x11d   :  { %2642 = vmatpush3.bf16.msra.mxu1 %v506_v58  ;;  %v2938_v39 = vpop.eup %2937  ;;  %v464_v42 = vmul.f32 %v2936_v29, %v399_v34  ;;  %v3377_v44 = vmul.f32 %v3329_v37, %v466_v33  ;;  %vm3406_vm3 = vmpackc.low %vm73_vm2, %vm73_vm2  ;;  %v62_v34 = vmul.u32 12, %v3236_v52  ;;  %vm599_vm2 = vcmask 1041408  }
 0x11e   :  { %2643 = vmatprep.subr.bf16.mxu1 %v4139_v49  ;;  %v503_v43 = vpack.c.bf16 %v3368_v32, %v3371_v35  ;;  %v2940_v47 = vpop.eup %2939  ;;  %v463_v48 = vmul.f32 %v2938_v39, %v394_v41  ;;  %v3381_v50 = vmul.f32 %v3329_v37, %v465_v36 }
 0x11f   :  { %v2942_v23 = vpop.eup %2941  ;;  %v3385_v57 = vmul.f32 %v3329_v37, %v464_v42  ;;  %v462_v58 = vmul.f32 %v2940_v47, %v389_v40  ;;  %v64_v36 = vadd.s32 12, %v62_v34  ;;  %vm63_vm13 = vcmp.ge.s32.totalorder %v3232_v51, %v62_v34 }
 0x120   :  { %v502_v55 = vpack.c.bf16 %v3377_v44, %v3381_v50  ;;  %v3390_v13 = vmul.f32 %v3329_v37, %v463_v48  ;;  %v461_v17 = vmul.f32 %v2942_v23, %v384_v16 }
 0x121   :  { %2644 = vmatpush3.bf16.msra.mxu1 %v505_v19  ;;  %v3394_v19 = vmul.f32 %v3329_v37, %v462_v58  ;;  %vm65_vm15 = vcmp.lt.s32.totalorder %v3232_v51, %v64_v36  ;;  %v3051_v58 = vmov 1966171168  }
 0x122   :  { %2645 = vmatprep.subr.bf16.mxu1 %v4139_v49  ;;  %v501_v21 = vpack.c.bf16 %v3385_v57, %v3390_v13  ;;  %v3401_v22 = vmul.f32 %v3329_v37, %v461_v17  ;;  %v26_v37 = vadd.s32 8, %v3236_v52  ;;  %vm66_vm1 = vmand %vm63_vm13, %vm65_vm15 }
 0x123   :  { %v67_v39 = vsel %vm66_vm1, 1.0, %v4139_v49 }
 0x124   :  { %v500_v24 = vpack.c.bf16 %v3394_v19, %v3401_v22  ;;  %vm35_vm5 = vcmp.ge.s32.totalorder %v26_v37, %v3239_v53  ;;  %vm42_vm7 = vcmp.lt.s32.totalorder %v26_v37, %v3244_v56  ;;  %v3455_v41 = vpack.c.bf16 %v67_v39, %v67_v39 }
 0x125   :  { %2646 = vmatpush3.bf16.msra.mxu1 %v504_v31  ;;  %vm48_vm9 = vmand %vm35_vm5, %vm42_vm7  ;;  %v3472_v37 = vsub.s32 0, %v3236_v52 }
 0x126   :  { %2647 = vmatprep.subr.bf16.mxu1 %v4139_v49  ;;  %vm3431_vm10 = vmpackc.low %vm48_vm9, %vm47_vm8  ;;  %v3459_v42 = vsel %vm599_vm2, %v3455_v41, 0 }
 0x127   :  { %v4181_v28 = vsel %vm3431_vm10, 4294967295, %v4180_v28  ;;  %2679 = vmatprep.subr.msk.bf16.mxu0 %vm3431_vm10, %v4137_v60 }
 0x128   :  { %4182 = vst [vmem:[#allocation18_spill] sm:$0xff] %v4181_v28  ;;  %2680 = vmatpush3.bf16.msk.msra.mxu0 %vm3431_vm10, %v4137_v60 }
 0x129   :  { %2648 = vmatpush3.bf16.msra.mxu1 %v503_v43  ;;  %2735 = vmatprep.subr.msk.bf16.mxu0 %vm3256_vm11, %v4137_v60 }
 0x12a   :  { %2649 = vmatprep.subr.bf16.mxu1 %v4139_v49 }
 0x12d   :  { %2650 = vmatpush3.bf16.msra.mxu1 %v502_v55  ;;  %v646_v55 = vunpack.c.l.s4 %v3051_v58 }
 0x12e   :  { %2651 = vmatprep.subr.bf16.mxu1 %v4139_v49 }
 0x12f   :  { %v647_v12 = vunpack.c.0.s8 %v646_v55 }
 0x131   :  { %2652 = vmatpush3.bf16.msra.mxu1 %v501_v21  ;;  %v3468_v16 = vsub.s32 %v647_v12, %v3236_v52 }
 0x132   :  { %2653 = vmatprep.subr.bf16.mxu1 %v4139_v49 }
 0x135   :  { %2654 = vmatpush3.bf16.msra.mxu1 %v500_v24 }
 0x136   :  { %2659 = vmatprep.subr.bf16.mxu1 %v4139_v49 }
 0x138   :  { %2656 = vmatmul.mubr.msk.bf16.vlgmr.msra.gmra.mxu1 %vm3406_vm3, %v4137_v60 }
 0x139   :  { %2660 = vmatpush3.bf16.msk.msra.mxu1 %vm3256_vm11, %v4137_v60  ;;  %2665 = vmatprep.mubr.msk.bf16.mxu1 %vm3049_vm0, %v4139_v49 }
 0x13a   :  { %2661 = vmatprep.subr.bf16.mxu1 %v4139_v49 }
 0x13d   :  { %2662 = vmatpush3.bf16.msk.msra.mxu1 %vm3266_vm14, %v4137_v60 }
 0x13e   :  { %2663 = vmatprep.subr.bf16.mxu1 %v4139_v49 }
 0x141   :  { %2664 = vmatpush3.bf16.msk.msra.mxu1 %vm3431_vm10, %v4137_v60 }
 0x142   :  { %2669 = vmatprep.subr.bf16.mxu1 %v4139_v49 }
 0x1f8   :  { %v542_v53 = vpop.f32.mrf.mxu1 }
 0x1f9   :  { %v548_v56 = vpack.c.bf16 %v542_v53, %v542_v53 }
 0x1fa   :  { %v2657_v29 = vpop.f32.mrf.mxu1 }
 0x1fb   :  { %2666 = vmatmul.mubr.msk.bf16.vlgmr.msra.gmra.mxu1 %vm549_vm12, %v548_v56 }
 0x1fc   :  { %v545_v31 = vpop.f32.mrf.mxu1  ;;  %2671 = vmatprep.mubr.msk.bf16.mxu1 %vm3049_vm0, %v4139_v49  ;;  %2670 = vmatpush3.bf16.msra.mxu1 %v3459_v42 }
 0x1fd   :  { %2885 = vmatprep.subr.msk.bf16.mxu1 %vm599_vm2, %v3455_v41 }
 0x1fe   :  { %v2658_v33 = vpop.f32.mrf.mxu1 }
 0x2bb   :  { %v587_v43 = vpop.f32.mrf.mxu1 }
 0x2bc   :  { %v588_v46 = vadd.f32 1e-06, %v587_v43 }
 0x2bd   :  { %v2667_v47 = vpop.f32.mrf.mxu1 }
 0x2be   :  { %2943 = vrcp.f32 %v588_v46 }
 0x2bf   :  { %v590_v51 = vpop.f32.mrf.mxu1 }
 0x2c1   :  { %v2668_v48 = vpop.f32.mrf.mxu1 }
 0x2cb   :  { %v2944_v23 = vpop.eup %2943 }
 0x2cc   :  { %v594_v40 = vpack.c.bf16 %v2944_v23, %v2944_v23 }
 0x2ce   :  { %2672 = vmatmul.mubr.msk.bf16.vlgmr.msra.gmra.mxu1 %vm595_vm4, %v594_v40 }
 0x2cf   :  { %2698 = vmatpush3.bf16.msra.mxu1 %v3459_v42 }
 0x2d0   :  { %2715 = vmatprep.subr.bf16.mxu1 %v4139_v49 }
 0x38e   :  { %v637_v17 = vpop.f32.mrf.mxu1 }
 0x38f   :  { %v644_v21 = vcombine.high %v637_v17, %v637_v17  ;;  %v651_v24 = vrot.slane %v637_v17, %v3468_v16 }
 0x390   :  { %v2673_v53 = vpop.f32.mrf.mxu1 }
 0x391   :  { %v659_v56 = vcombine.high %v651_v24, %v651_v24  ;;  %v667_v29 = vrot.slane %v651_v24, %v3468_v16  ;;  %v658_v33 = vrot.slane %v644_v21, %v3468_v16 }
 0x392   :  { %v640_v31 = vpop.f32.mrf.mxu1 }
 0x393   :  { %v681_v34 = vrot.slane %v659_v56, %v3468_v16  ;;  %v689_v36 = vcombine.high %v667_v29, %v667_v29  ;;  %v696_v39 = vrot.slane %v667_v29, %v3472_v37  ;;  %v674_v23 = vrot.slane %v658_v33, %v3468_v16 }
 0x394   :  { %v2674_v43 = vpop.f32.mrf.mxu1  ;;  %v660_v17 = vcombine.high %v658_v33, %v658_v33 }
 0x395   :  { %v700_v46 = vrot.slane %v681_v34, %v3472_v37  ;;  %v691_v47 = vcombine.high %v681_v34, %v681_v34  ;;  %v704_v51 = vrot.slane %v689_v36, %v3472_v37  ;;  %v3481_v52 = vmul.f32 %v696_v39, %v3401_v22 }
 0x396   :  { %v3484_v48 = vmul.f32 %v696_v39, %v3394_v19  ;;  %v690_v53 = vcombine.high %v674_v23, %v674_v23 }
 0x397   :  { %v3488_v40 = vmul.f32 %v700_v46, %v3390_v13  ;;  %v3491_v58 = vmul.f32 %v700_v46, %v3385_v57  ;;  %v3496_v12 = vmul.f32 %v704_v51, %v3381_v50  ;;  %v3499_v22 = vmul.f32 %v704_v51, %v3377_v44 }
 0x398   :  { %v766_v55 = vpack.c.bf16 %v3484_v48, %v3481_v52  ;;  %v708_v19 = vrot.slane %v691_v47, %v3472_v37  ;;  %v712_v57 = vrot.slane %v674_v23, %v3472_v37  ;;  %v688_v44 = vrot.slane %v660_v17, %v3468_v16  ;;  %v3575_v23 = vpop.permute.xlu1 %918 }
 0x399   :  { %v767_v21 = vpack.c.bf16 %v3491_v58, %v3488_v40  ;;  %v768_v13 = vpack.c.bf16 %v3499_v22, %v3496_v12  ;;  %v720_v31 = vrot.slane %v690_v53, %v3472_v37 }
 0x39a   :  { %2681 = vmatprep.mubr.msk.bf16.mxu0 %vm549_vm12, %v766_v55  ;;  %v3515_v50 = vmul.f32 %v708_v19, %v3371_v35  ;;  %v3518_v24 = vmul.f32 %v708_v19, %v3368_v32  ;;  %v3524_v56 = vmul.f32 %v712_v57, %v3362_v27  ;;  %v3527_v29 = vmul.f32 %v712_v57, %v3359_v20 }
 0x39b   :  { %2682 = vmatmul.mubr.msk.bf16.vlgmr.msra.gmra.mxu0 %vm549_vm12, %v767_v21  ;;  %v716_v35 = vrot.slane %v688_v44, %v3472_v37  ;;  %v692_v20 = vcombine.high %v688_v44, %v688_v44  ;;  %v3554_v36 = vmul.f32 %v720_v31, %v3344_v54  ;;  %v3557_v39 = vmul.f32 %v720_v31, %v3341_v45  ;;  %v3577_v21 = vpop.permute.xlu0 %913 }
 0x39c   :  { %2685 = vmatprep.mubr.msk.bf16.mxu0 %vm549_vm12, %v768_v13  ;;  %2736 = vmatpush3.bf16.msk.msra.mxu0 %vm3256_vm11, %v4137_v60  ;;  %v769_v32 = vpack.c.bf16 %v3518_v24, %v3515_v50  ;;  %v770_v27 = vpack.c.bf16 %v3527_v29, %v3524_v56  ;;  %v3579_v44 = vpop.permute.xlu1 %928 }
 0x39d   :  { %2737 = vmatprep.subr.msk.bf16.mxu0 %vm3266_vm14, %v4137_v60  ;;  %v3547_v33 = vmul.f32 %v716_v35, %v3353_v15  ;;  %v3550_v34 = vmul.f32 %v716_v35, %v3350_v10  ;;  %v724_v46 = vrot.slane %v692_v20, %v3472_v37  ;;  %v772_v15 = vpack.c.bf16 %v3557_v39, %v3554_v36 }
 0x39f   :  { %v771_v43 = vpack.c.bf16 %v3550_v34, %v3547_v33  ;;  %v3567_v10 = vmul.f32 %v724_v46, %v3332_v38  ;;  %v3570_v54 = vmul.f32 %v724_v46, %v3335_v30  ;;  %v3581_v35 = vpop.permute.xlu0 %923 }
 0x3a0   :  { %2738 = vmatpush3.bf16.msk.msra.mxu0 %vm3266_vm14, %v4137_v60  ;;  %v3583_v46 = vpop.permute.xlu1 %938 }
 0x3a1   :  { %2739 = vmatprep.subr.msk.bf16.mxu0 %vm3431_vm10, %v4137_v60  ;;  %v773_v45 = vpack.c.bf16 %v3570_v54, %v3567_v10 }
 0x3a3   :  { %2686 = vmatmul.mubr.msk.bf16.gmra.mxu0 %vm549_vm12, %v769_v32 }
 0x3a4   :  { %2689 = vmatprep.mubr.msk.bf16.mxu0 %vm549_vm12, %v770_v27  ;;  %2740 = vmatpush3.bf16.msk.msra.mxu0 %vm3431_vm10, %v4137_v60 }
 0x3a5   :  { %2775 = vmatprep.subr.bf16.mxu0 %v4139_v49 }
 0x3ab   :  { %2690 = vmatmul.mubr.msk.bf16.gmra.mxu0 %vm549_vm12, %v771_v43 }
 0x3ac   :  { %2693 = vmatprep.mubr.msk.bf16.mxu0 %vm549_vm12, %v772_v15 }
 0x3b3   :  { %2694 = vmatmul.mubr.msk.bf16.gmra.mxu0 %vm549_vm12, %v773_v45 }
 0x45b   :  { %v2683_v47 = vpop.f32.mrf.mxu0 }
 0x45c   :  { %v841_v17 = vadd.f32 1e-06, %v2683_v47  ;;  %v3585_v47 = vpop.permute.xlu0 %933 }
 0x45d   :  { %v832_v51 = vpop.f32.mrf.mxu0 }
 0x45e   :  { %v833_v55 = vadd.f32 1e-06, %v832_v51 }
 0x45f   :  { %v2684_v19 = vpop.f32.mrf.mxu0 }
 0x460   :  { %v844_v57 = vadd.f32 1e-06, %v2684_v19  ;;  %2945 = vrcp.f32 %v833_v55 }
 0x461   :  { %v835_v38 = vpop.f32.mrf.mxu0 }
 0x462   :  { %2947 = vrcp.f32 %v844_v57  ;;  %v836_v30 = vadd.f32 1e-06, %v835_v38 }
 0x463   :  { %2949 = vrcp.f32 %v841_v17  ;;  %v2687_v13 = vpop.f32.mrf.mxu0 }
 0x464   :  { %2951 = vrcp.f32 %v836_v30  ;;  %v857_v31 = vadd.f32 1e-06, %v2687_v13  ;;  %v3587_v13 = vpop.permute.xlu1 %948 }
 0x465   :  { %v848_v53 = vpop.f32.mrf.mxu0 }
 0x466   :  { %v849_v32 = vadd.f32 1e-06, %v848_v53 }
 0x467   :  { %v2688_v27 = vpop.f32.mrf.mxu0 }
 0x468   :  { %v860_v20 = vadd.f32 1e-06, %v2688_v27  ;;  %2953 = vrcp.f32 %v849_v32  ;;  %v3595_v63 = vpop.permute.xlu1 %958 }
 0x469   :  { %v851_v43 = vpop.f32.mrf.mxu0 }
 0x46a   :  { %2955 = vrcp.f32 %v860_v20  ;;  %v852_v15 = vadd.f32 1e-06, %v851_v43 }
 0x46b   :  { %2957 = vrcp.f32 %v857_v31  ;;  %v2691_v45 = vpop.f32.mrf.mxu0  ;;  %v3590_v31 = vpop.permute.xlu0 %943 }
 0x46c   :  { %2959 = vrcp.f32 %v852_v15  ;;  %v873_v57 = vadd.f32 1e-06, %v2691_v45 }
 0x46d   :  { %v864_v51 = vpop.f32.mrf.mxu0  ;;  %v2946_v55 = vpop.eup %2945 }
 0x46e   :  { %v865_v17 = vadd.f32 1e-06, %v864_v51  ;;  %v991_v15 = vmul.f32 %v2946_v55, %v3577_v21 }
 0x46f   :  { %v2948_v19 = vpop.eup %2947  ;;  %v2692_v38 = vpop.f32.mrf.mxu0 }
 0x470   :  { %v2950_v30 = vpop.eup %2949  ;;  %v876_v53 = vadd.f32 1e-06, %v2692_v38  ;;  %2961 = vrcp.f32 %v865_v17  ;;  %v994_v20 = vmul.f32 %v2948_v19, %v3579_v44 }
 0x471   :  { %v2952_v32 = vpop.eup %2951  ;;  %v867_v27 = vpop.f32.mrf.mxu0  ;;  %v993_v60 = vmul.f32 %v2950_v30, %v3581_v35 }
 0x472   :  { %2963 = vrcp.f32 %v876_v53  ;;  %v868_v43 = vadd.f32 1e-06, %v867_v27  ;;  %v992_v51 = vmul.f32 %v2952_v32, %v3575_v23 }
 0x473   :  { %2965 = vrcp.f32 %v873_v57  ;;  %v2695_v45 = vpop.f32.mrf.mxu0  ;;  %v1008_v1 = vpack.c.bf16 %v994_v20, %v993_v60  ;;  %v3599_v57 = vpop.permute.xlu0 %953 }
 0x474   :  { %2967 = vrcp.f32 %v868_v43  ;;  %v1007_v49 = vpack.c.bf16 %v992_v51, %v991_v15  ;;  %v889_v27 = vadd.f32 1e-06, %v2695_v45  ;;  %v3605_v45 = vpop.permute.xlu1 %968 }
 0x475   :  { %v880_v38 = vpop.f32.mrf.mxu0  ;;  %v2954_v17 = vpop.eup %2953 }
 0x476   :  { %v881_v19 = vadd.f32 1e-06, %v880_v38  ;;  %2699 = vmatprep.mubr.msk.bf16.mxu1 %vm595_vm4, %v1007_v49  ;;  %v995_v15 = vmul.f32 %v2954_v17, %v3585_v47 }
 0x477   :  { %v2956_v53 = vpop.eup %2955  ;;  %v2696_v0 = vpop.f32.mrf.mxu0  ;;  %2700 = vmatmul.mubr.msk.bf16.vlgmr.msra.gmra.mxu1 %vm595_vm4, %v1008_v1 }
 0x478   :  { %v2958_v55 = vpop.eup %2957  ;;  %v892_v32 = vadd.f32 1e-06, %v2696_v0  ;;  %2969 = vrcp.f32 %v881_v19  ;;  %v998_v60 = vmul.f32 %v2956_v53, %v3587_v13  ;;  %v3607_v62 = vpop.permute.xlu0 %963 }
 0x479   :  { %v2960_v30 = vpop.eup %2959  ;;  %v883_v43 = vpop.f32.mrf.mxu0  ;;  %v997_v51 = vmul.f32 %v2958_v55, %v3590_v31 }
 0x47a   :  { %2971 = vrcp.f32 %v892_v32  ;;  %v884_v20 = vadd.f32 1e-06, %v883_v43  ;;  %v996_v49 = vmul.f32 %v2960_v30, %v3583_v46 }
 0x47b   :  { %2973 = vrcp.f32 %v889_v27  ;;  %v1010_v38 = vpack.c.bf16 %v998_v60, %v997_v51  ;;  %v3612_v27 = vpop.permute.xlu1 %978 }
 0x47c   :  { %2975 = vrcp.f32 %v884_v20  ;;  %v1009_v1 = vpack.c.bf16 %v996_v49, %v995_v15  ;;  %v3617_v60 = vpop.permute.xlu0 %973 }
 0x47d   :  { %v2962_v0 = vpop.eup %2961 }
 0x47e   :  { %2703 = vmatprep.mubr.msk.bf16.mxu1 %vm595_vm4, %v1009_v1  ;;  %v999_v55 = vmul.f32 %v2962_v0, %v3599_v57 }
 0x47f   :  { %v2964_v19 = vpop.eup %2963  ;;  %2704 = vmatmul.mubr.msk.bf16.gmra.mxu1 %vm595_vm4, %v1010_v38  ;;  %v3621_v38 = vpop.permute.xlu1 %988 }
 0x480   :  { %v2966_v53 = vpop.eup %2965  ;;  %v1002_v32 = vmul.f32 %v2964_v19, %v3605_v45  ;;  %v3624_v5 = vpop.permute.xlu0 %983 }
 0x481   :  { %v2968_v17 = vpop.eup %2967  ;;  %v1001_v43 = vmul.f32 %v2966_v53, %v3607_v62 }
 0x482   :  { %v1000_v30 = vmul.f32 %v2968_v17, %v3595_v63 }
 0x483   :  { %v1012_v15 = vpack.c.bf16 %v1002_v32, %v1001_v43  ;;  %v4183_v43 = vmov 0.0  }
 0x484   :  { %v1011_v20 = vpack.c.bf16 %v1000_v30, %v999_v55 }
 0x485   :  { %v2970_v49 = vpop.eup %2969 }
 0x486   :  { %2707 = vmatprep.mubr.msk.bf16.mxu1 %vm595_vm4, %v1011_v20  ;;  %v1003_v53 = vmul.f32 %v2970_v49, %v3617_v60 }
 0x487   :  { %v2972_v51 = vpop.eup %2971  ;;  %2708 = vmatmul.mubr.msk.bf16.gmra.mxu1 %vm595_vm4, %v1012_v15 }
 0x488   :  { %v2974_v1 = vpop.eup %2973  ;;  %v1006_v0 = vmul.f32 %v2972_v51, %v3621_v38 }
 0x489   :  { %v2976_v19 = vpop.eup %2975  ;;  %v1005_v32 = vmul.f32 %v2974_v1, %v3624_v5 }
 0x48a   :  { %v1004_v17 = vmul.f32 %v2976_v19, %v3612_v27 }
 0x48b   :  { %v1014_v30 = vpack.c.bf16 %v1006_v0, %v1005_v32 }
 0x48c   :  { %v1013_v55 = vpack.c.bf16 %v1004_v17, %v1003_v53 }
 0x48e   :  { %2711 = vmatprep.mubr.msk.bf16.mxu1 %vm595_vm4, %v1013_v55 }
 0x48f   :  { %2712 = vmatmul.mubr.msk.bf16.gmra.mxu1 %vm595_vm4, %v1014_v30 }
 0x490   :  { %2731 = vmatprep.mubr.msk.bf16.mxu1 %vm3049_vm0, %v4183_v43 }
 0x537   :  { %v2701_v20 = vpop.f32.mrf.mxu1 }
 0x539   :  { %v1073_v15 = vpop.f32.mrf.mxu1 }
 0x53b   :  { %v2702_v51 = vpop.f32.mrf.mxu1 }
 0x53d   :  { %v1076_v3 = vpop.f32.mrf.mxu1 }
 0x53f   :  { %v2705_v4 = vpop.f32.mrf.mxu1 }
 0x541   :  { %v1089_v2 = vpop.f32.mrf.mxu1 }
 0x543   :  { %v2706_v49 = vpop.f32.mrf.mxu1 }
 0x545   :  { %v1092_v9 = vpop.f32.mrf.mxu1 }
 0x547   :  { %v2709_v19 = vpop.f32.mrf.mxu1 }
 0x549   :  { %v1105_v7 = vpop.f32.mrf.mxu1 }
 0x54b   :  { %v2710_v1 = vpop.f32.mrf.mxu1 }
 0x54c   :  { %v3649_v18 = vmul.f32 %v2710_v1, %v3550_v34  ;;  %v3667_v34 = vmul.f32 %v2706_v49, %v3518_v24  ;;  %v1139_v24 = vmul.f32 %v2702_v51, %v3491_v58  ;;  %v1138_v49 = vmul.f32 %v2701_v20, %v3488_v40 }
 0x54d   :  { %v1108_v53 = vpop.f32.mrf.mxu1  ;;  %v1136_v1 = vmul.f32 %v1073_v15, %v3481_v52 }
 0x54f   :  { %v2713_v0 = vpop.f32.mrf.mxu1 }
 0x550   :  { %v3634_v55 = vmul.f32 %v2713_v0, %v3567_v10 }
 0x551   :  { %v1121_v17 = vpop.f32.mrf.mxu1 }
 0x552   :  { %v3645_v14 = vmul.f32 %v1121_v17, %v3554_v36  ;;  %v3660_v36 = vmul.f32 %v1108_v53, %v3527_v29 }
 0x553   :  { %v2714_v32 = vpop.f32.mrf.mxu1 }
 0x554   :  { %v3637_v30 = vmul.f32 %v2714_v32, %v3570_v54  ;;  %v3654_v54 = vmul.f32 %v2709_v19, %v3547_v33  ;;  %v1141_v19 = vmul.f32 %v1092_v9, %v3499_v22  ;;  %v4184_v9 = vmov 1.0|1.0  }
 0x555   :  { %v1124_v8 = vpop.f32.mrf.mxu1 }
 0x556   :  { %v1159_v6 = vpack.c.bf16 %v3637_v30, %v3634_v55  ;;  %v3642_v26 = vmul.f32 %v1124_v8, %v3557_v39  ;;  %v1157_v8 = vpack.c.bf16 %v3649_v18, %v3654_v54  ;;  %v1142_v39 = vmul.f32 %v2705_v4, %v3515_v50 }
 0x557   :  { %v1153_v4 = vpack.c.bf16 %v1139_v24, %v1138_v49  ;;  %v1137_v50 = vmul.f32 %v1076_v3, %v3484_v48 }
 0x558   :  { %2716 = vmatpush3.bf16.msra.mxu1 %v1159_v6  ;;  %v1158_v10 = vpack.c.bf16 %v3642_v26, %v3645_v14  ;;  %v3663_v6 = vmul.f32 %v1105_v7, %v3524_v56  ;;  %v1155_v29 = vpack.c.bf16 %v3667_v34, %v1142_v39  ;;  %v1140_v7 = vmul.f32 %v1089_v2, %v3496_v12  ;;  %v3695_v12 = vld [vmem:[%s4135_s4] ss:$0 sm:$0xff] }
 0x559   :  { %2717 = vmatprep.subr.bf16.mxu1 %v4183_v43  ;;  %v1152_v2 = vpack.c.bf16 %v1137_v50, %v1136_v1 }
 0x55a   :  { %v1156_v33 = vpack.c.bf16 %v3660_v36, %v3663_v6  ;;  %v1154_v56 = vpack.c.bf16 %v1141_v19, %v1140_v7 }
 0x55c   :  { %2718 = vmatpush3.bf16.msra.mxu1 %v1158_v10 }
 0x55d   :  { %2719 = vmatprep.subr.bf16.mxu1 %v4183_v43 }
 0x560   :  { %2720 = vmatpush3.bf16.msra.mxu1 %v1157_v8 }
 0x561   :  { %2721 = vmatprep.subr.bf16.mxu1 %v4183_v43 }
 0x564   :  { %2722 = vmatpush3.bf16.msra.mxu1 %v1156_v33 }
 0x565   :  { %2723 = vmatprep.subr.bf16.mxu1 %v4183_v43 }
 0x568   :  { %2724 = vmatpush3.bf16.msra.mxu1 %v1155_v29 }
 0x569   :  { %2725 = vmatprep.subr.bf16.mxu1 %v4183_v43 }
 0x56c   :  { %2726 = vmatpush3.bf16.msra.mxu1 %v1154_v56 }
 0x56d   :  { %2727 = vmatprep.subr.bf16.mxu1 %v4183_v43 }
 0x570   :  { %2728 = vmatpush3.bf16.msra.mxu1 %v1153_v4 }
 0x571   :  { %2729 = vmatprep.subr.bf16.mxu1 %v4183_v43 }
 0x574   :  { %2730 = vmatpush3.bf16.msra.mxu1 %v1152_v2 }
 0x575   :  { %2886 = vmatprep.subr.msk.bf16.mxu1 %vm599_vm2, %v3455_v41 }
 0x577   :  { %2732 = vmatmul.mubr.msk.bf16.vlgmr.msra.gmra.mxu1 %vm3406_vm3, %v4184_v9 }
 0x578   :  { %2758 = vmatpush3.bf16.msra.mxu1 %v3459_v42 }
 0x579   :  { %2795 = vmatprep.subr.msk.bf16.mxu1 %vm3256_vm11, %v4184_v9 }
 0x637   :  { %v1194_v3 = vpop.f32.mrf.mxu1 }
 0x638   :  { %v1195_v52 = vadd.f32 1e-06, %v1194_v3 }
 0x639   :  { %v2733_v48 = vpop.f32.mrf.mxu1 }
 0x63a   :  { %2977 = vrcp.f32 %v1195_v52 }
 0x63b   :  { %v1197_v40 = vpop.f32.mrf.mxu1 }
 0x63d   :  { %v2734_v58 = vpop.f32.mrf.mxu1 }
 0x647   :  { %v2978_v22 = vpop.eup %2977 }
 0x648   :  { %v1207_v20 = vmul.f32 %v2978_v22, %v3695_v12 }
 0x64a   :  { %v1209_v15 = vcombine.high %v1207_v20, %v1207_v20  ;;  %v1216_v51 = vrot.slane %v1207_v20, %v3468_v16 }
 0x64c   :  { %v1224_v53 = vcombine.high %v1216_v51, %v1216_v51  ;;  %v1232_v0 = vrot.slane %v1216_v51, %v3468_v16  ;;  %v1223_v17 = vrot.slane %v1209_v15, %v3468_v16 }
 0x64e   :  { %v1246_v32 = vrot.slane %v1224_v53, %v3468_v16  ;;  %v1261_v10 = vrot.slane %v1232_v0, %v3472_v37  ;;  %v1254_v8 = vcombine.high %v1232_v0, %v1232_v0  ;;  %v1239_v3 = vrot.slane %v1223_v17, %v3468_v16 }
 0x64f   :  { %v1225_v20 = vcombine.high %v1223_v17, %v1223_v17 }
 0x650   :  { %v3703_v33 = vmul.f32 %v1261_v10, %v1136_v1  ;;  %v3705_v29 = vmul.f32 %v1261_v10, %v1137_v50  ;;  %v1265_v56 = vrot.slane %v1246_v32, %v3472_v37  ;;  %v1269_v4 = vrot.slane %v1254_v8, %v3472_v37 }
 0x651   :  { %v1256_v2 = vcombine.high %v1246_v32, %v1246_v32  ;;  %v1255_v0 = vcombine.high %v1239_v3, %v1239_v3 }
 0x652   :  { %v1314_v52 = vpack.c.bf16 %v3705_v29, %v3703_v33  ;;  %v3712_v48 = vmul.f32 %v1265_v56, %v1138_v49  ;;  %v3714_v40 = vmul.f32 %v1265_v56, %v1139_v24  ;;  %v3716_v58 = vmul.f32 %v1269_v4, %v1140_v7 }
 0x653   :  { %v3718_v1 = vmul.f32 %v1269_v4, %v1141_v19  ;;  %v1273_v22 = vrot.slane %v1256_v2, %v3472_v37  ;;  %v1277_v49 = vrot.slane %v1239_v3, %v3472_v37  ;;  %v1253_v24 = vrot.slane %v1225_v20, %v3468_v16 }
 0x654   :  { %2741 = vmatprep.mubr.msk.bf16.mxu0 %vm549_vm12, %v1314_v52  ;;  %v1315_v50 = vpack.c.bf16 %v3714_v40, %v3712_v48 }
 0x655   :  { %v1316_v15 = vpack.c.bf16 %v3718_v1, %v3716_v58  ;;  %v3729_v7 = vmul.f32 %v1273_v22, %v1142_v39  ;;  %v3732_v19 = vmul.f32 %v1273_v22, %v3667_v34  ;;  %v3736_v51 = vmul.f32 %v1277_v49, %v3663_v6 }
 0x656   :  { %2742 = vmatmul.mubr.msk.bf16.vlgmr.msra.gmra.mxu0 %vm549_vm12, %v1315_v50  ;;  %v3739_v53 = vmul.f32 %v1277_v49, %v3660_v36  ;;  %v1281_v32 = vrot.slane %v1253_v24, %v3472_v37  ;;  %v1285_v34 = vrot.slane %v1255_v0, %v3472_v37  ;;  %v1257_v10 = vcombine.high %v1253_v24, %v1253_v24 }
 0x657   :  { %2745 = vmatprep.mubr.msk.bf16.mxu0 %vm549_vm12, %v1316_v15  ;;  %v1317_v17 = vpack.c.bf16 %v3732_v19, %v3729_v7 }
 0x658   :  { %v1318_v39 = vpack.c.bf16 %v3739_v53, %v3736_v51  ;;  %v3750_v6 = vmul.f32 %v1281_v32, %v3654_v54  ;;  %v3753_v36 = vmul.f32 %v1281_v32, %v3649_v18  ;;  %v3756_v8 = vmul.f32 %v1285_v34, %v3645_v14 }
 0x659   :  { %v3759_v56 = vmul.f32 %v1285_v34, %v3642_v26  ;;  %v1289_v2 = vrot.slane %v1257_v10, %v3472_v37 }
 0x65a   :  { %v1319_v4 = vpack.c.bf16 %v3753_v36, %v3750_v6 }
 0x65b   :  { %v1320_v3 = vpack.c.bf16 %v3759_v56, %v3756_v8  ;;  %v3769_v18 = vmul.f32 %v1289_v2, %v3634_v55  ;;  %v3772_v14 = vmul.f32 %v1289_v2, %v3637_v30 }
 0x65d   :  { %v1321_v26 = vpack.c.bf16 %v3772_v14, %v3769_v18 }
 0x65e   :  { %2746 = vmatmul.mubr.msk.bf16.gmra.mxu0 %vm549_vm12, %v1317_v17 }
 0x65f   :  { %2749 = vmatprep.mubr.msk.bf16.mxu0 %vm549_vm12, %v1318_v39 }
 0x666   :  { %2750 = vmatmul.mubr.msk.bf16.gmra.mxu0 %vm549_vm12, %v1319_v4 }
 0x667   :  { %2753 = vmatprep.mubr.msk.bf16.mxu0 %vm549_vm12, %v1320_v3 }
 0x66e   :  { %2754 = vmatmul.mubr.msk.bf16.gmra.mxu0 %vm549_vm12, %v1321_v26 }
 0x66f   :  { %2791 = vmatprep.mubr.msk.bf16.mxu0 %vm3049_vm0, %v4183_v43 }
 0x716   :  { %v2743_v54 = vpop.f32.mrf.mxu0 }
 0x717   :  { %v1389_v22 = vadd.f32 1e-06, %v2743_v54 }
 0x718   :  { %v1380_v52 = vpop.f32.mrf.mxu0 }
 0x719   :  { %v1381_v50 = vadd.f32 1e-06, %v1380_v52 }
 0x71a   :  { %v2744_v20 = vpop.f32.mrf.mxu0 }
 0x71b   :  { %v1392_v15 = vadd.f32 1e-06, %v2744_v20  ;;  %2979 = vrcp.f32 %v1381_v50 }
 0x71c   :  { %v1383_v55 = vpop.f32.mrf.mxu0 }
 0x71d   :  { %2981 = vrcp.f32 %v1392_v15  ;;  %v1384_v49 = vadd.f32 1e-06, %v1383_v55 }
 0x71e   :  { %2983 = vrcp.f32 %v1389_v22  ;;  %v2747_v30 = vpop.f32.mrf.mxu0 }
 0x71f   :  { %2985 = vrcp.f32 %v1384_v49  ;;  %v1405_v17 = vadd.f32 1e-06, %v2747_v30 }
 0x720   :  { %v1396_v24 = vpop.f32.mrf.mxu0 }
 0x721   :  { %v1397_v0 = vadd.f32 1e-06, %v1396_v24 }
 0x722   :  { %v2748_v32 = vpop.f32.mrf.mxu0 }
 0x723   :  { %v1408_v39 = vadd.f32 1e-06, %v2748_v32  ;;  %2987 = vrcp.f32 %v1397_v0 }
 0x724   :  { %v1399_v34 = vpop.f32.mrf.mxu0 }
 0x725   :  { %2989 = vrcp.f32 %v1408_v39  ;;  %v1400_v10 = vadd.f32 1e-06, %v1399_v34 }
 0x726   :  { %2991 = vrcp.f32 %v1405_v17  ;;  %v2751_v4 = vpop.f32.mrf.mxu0 }
 0x727   :  { %2993 = vrcp.f32 %v1400_v10  ;;  %v1421_v52 = vadd.f32 1e-06, %v2751_v4 }
 0x728   :  { %v1412_v2 = vpop.f32.mrf.mxu0  ;;  %v2980_v3 = vpop.eup %2979 }
 0x729   :  { %v1413_v26 = vadd.f32 1e-06, %v1412_v2  ;;  %v1459_v24 = vmul.f32 %v2980_v3, %v3577_v21 }
 0x72a   :  { %v2982_v54 = vpop.eup %2981  ;;  %v2752_v50 = vpop.f32.mrf.mxu0 }
 0x72b   :  { %v2984_v22 = vpop.eup %2983  ;;  %v1424_v20 = vadd.f32 1e-06, %v2752_v50  ;;  %2995 = vrcp.f32 %v1413_v26  ;;  %v1462_v49 = vmul.f32 %v2982_v54, %v3579_v44 }
 0x72c   :  { %v2986_v15 = vpop.eup %2985  ;;  %v1415_v55 = vpop.f32.mrf.mxu0  ;;  %v1461_v32 = vmul.f32 %v2984_v22, %v3581_v35 }
 0x72d   :  { %2997 = vrcp.f32 %v1424_v20  ;;  %v1416_v30 = vadd.f32 1e-06, %v1415_v55  ;;  %v1460_v0 = vmul.f32 %v2986_v15, %v3575_v23 }
 0x72e   :  { %2999 = vrcp.f32 %v1421_v52  ;;  %v2755_v17 = vpop.f32.mrf.mxu0  ;;  %v1476_v10 = vpack.c.bf16 %v1462_v49, %v1461_v32 }
 0x72f   :  { %3001 = vrcp.f32 %v1416_v30  ;;  %v1475_v39 = vpack.c.bf16 %v1460_v0, %v1459_v24  ;;  %v1437_v54 = vadd.f32 1e-06, %v2755_v17 }
 0x730   :  { %v1428_v34 = vpop.f32.mrf.mxu0  ;;  %v2988_v4 = vpop.eup %2987 }
 0x731   :  { %v1429_v2 = vadd.f32 1e-06, %v1428_v34  ;;  %2759 = vmatprep.mubr.msk.bf16.mxu1 %vm595_vm4, %v1475_v39  ;;  %v1463_v49 = vmul.f32 %v2988_v4, %v3585_v47 }
 0x732   :  { %v2990_v26 = vpop.eup %2989  ;;  %v2756_v50 = vpop.f32.mrf.mxu0  ;;  %2760 = vmatmul.mubr.msk.bf16.vlgmr.msra.gmra.mxu1 %vm595_vm4, %v1476_v10 }
 0x733   :  { %v2992_v3 = vpop.eup %2991  ;;  %v1440_v20 = vadd.f32 1e-06, %v2756_v50  ;;  %2796 = vmatpush3.bf16.msk.msra.mxu1 %vm3256_vm11, %v4184_v9  ;;  %3003 = vrcp.f32 %v1429_v2  ;;  %v1466_v15 = vmul.f32 %v2990_v26, %v3587_v13 }
 0x734   :  { %v2994_v52 = vpop.eup %2993  ;;  %v1431_v22 = vpop.f32.mrf.mxu0  ;;  %2797 = vmatprep.subr.msk.bf16.mxu1 %vm3266_vm14, %v4184_v9  ;;  %v1465_v24 = vmul.f32 %v2992_v3, %v3590_v31 }
 0x735   :  { %3005 = vrcp.f32 %v1440_v20  ;;  %v1432_v55 = vadd.f32 1e-06, %v1431_v22  ;;  %v1464_v30 = vmul.f32 %v2994_v52, %v3583_v46 }
 0x736   :  { %3007 = vrcp.f32 %v1437_v54  ;;  %v1478_v17 = vpack.c.bf16 %v1466_v15, %v1465_v24 }
 0x737   :  { %3009 = vrcp.f32 %v1432_v55  ;;  %v1477_v0 = vpack.c.bf16 %v1464_v30, %v1463_v49  ;;  %2798 = vmatpush3.bf16.msk.msra.mxu1 %vm3266_vm14, %v4184_v9 }
 0x738   :  { %2799 = vmatprep.subr.msk.bf16.mxu1 %vm3431_vm10, %v4184_v9  ;;  %v2996_v32 = vpop.eup %2995 }
 0x739   :  { %2763 = vmatprep.mubr.msk.bf16.mxu1 %vm595_vm4, %v1477_v0  ;;  %v1467_v2 = vmul.f32 %v2996_v32, %v3599_v57 }
 0x73a   :  { %v2998_v39 = vpop.eup %2997  ;;  %2764 = vmatmul.mubr.msk.bf16.gmra.mxu1 %vm595_vm4, %v1478_v17 }
 0x73b   :  { %v3000_v34 = vpop.eup %2999  ;;  %2800 = vmatpush3.bf16.msk.msra.mxu1 %vm3431_vm10, %v4184_v9  ;;  %v1470_v4 = vmul.f32 %v2998_v39, %v3605_v45 }
 0x73c   :  { %v3002_v10 = vpop.eup %3001  ;;  %2835 = vmatprep.subr.bf16.mxu1 %v4183_v43  ;;  %v1469_v54 = vmul.f32 %v3000_v34, %v3607_v62 }
 0x73d   :  { %v1468_v26 = vmul.f32 %v3002_v10, %v3595_v63 }
 0x73e   :  { %v1480_v3 = vpack.c.bf16 %v1470_v4, %v1469_v54 }
 0x73f   :  { %v1479_v50 = vpack.c.bf16 %v1468_v26, %v1467_v2 }
 0x740   :  { %v3004_v20 = vpop.eup %3003 }
 0x741   :  { %2767 = vmatprep.mubr.msk.bf16.mxu1 %vm595_vm4, %v1479_v50  ;;  %v1471_v49 = vmul.f32 %v3004_v20, %v3617_v60 }
 0x742   :  { %v3006_v52 = vpop.eup %3005  ;;  %2768 = vmatmul.mubr.msk.bf16.gmra.mxu1 %vm595_vm4, %v1480_v3 }
 0x743   :  { %v3008_v22 = vpop.eup %3007  ;;  %v1474_v55 = vmul.f32 %v3006_v52, %v3621_v38 }
 0x744   :  { %v3010_v15 = vpop.eup %3009  ;;  %v1473_v24 = vmul.f32 %v3008_v22, %v3624_v5 }
 0x745   :  { %v1472_v30 = vmul.f32 %v3010_v15, %v3612_v27 }
 0x746   :  { %v1482_v17 = vpack.c.bf16 %v1474_v55, %v1473_v24 }
 0x747   :  { %v1481_v0 = vpack.c.bf16 %v1472_v30, %v1471_v49 }
 0x749   :  { %2771 = vmatprep.mubr.msk.bf16.mxu1 %vm595_vm4, %v1481_v0 }
 0x74a   :  { %2772 = vmatmul.mubr.msk.bf16.gmra.mxu1 %vm595_vm4, %v1482_v17 }
 0x7f2   :  { %v2761_v32 = vpop.f32.mrf.mxu1 }
 0x7f4   :  { %v1541_v39 = vpop.f32.mrf.mxu1 }
 0x7f6   :  { %v2762_v34 = vpop.f32.mrf.mxu1 }
 0x7f8   :  { %v1544_v10 = vpop.f32.mrf.mxu1 }
 0x7fa   :  { %v2765_v4 = vpop.f32.mrf.mxu1 }
 0x7fc   :  { %v1557_v2 = vpop.f32.mrf.mxu1 }
 0x7fe   :  { %v2766_v26 = vpop.f32.mrf.mxu1 }
 0x800   :  { %v1560_v54 = vpop.f32.mrf.mxu1 }
 0x802   :  { %v2769_v50 = vpop.f32.mrf.mxu1 }
 0x804   :  { %v1573_v3 = vpop.f32.mrf.mxu1 }
 0x806   :  { %v2770_v20 = vpop.f32.mrf.mxu1 }
 0x807   :  { %v3835_v28 = vmul.f32 %v2770_v20, %v3753_v36  ;;  %v1611_v36 = vmul.f32 %v2766_v26, %v3732_v19  ;;  %v1606_v19 = vmul.f32 %v2761_v32, %v3712_v48  ;;  %v1604_v26 = vmul.f32 %v1541_v39, %v3703_v33 }
 0x808   :  { %v1576_v52 = vpop.f32.mrf.mxu1 }
 0x80a   :  { %v2773_v15 = vpop.f32.mrf.mxu1 }
 0x80b   :  { %v3820_v55 = vmul.f32 %v2773_v15, %v3769_v18  ;;  %v3849_v15 = vmul.f32 %v1573_v3, %v3736_v51  ;;  %v1607_v51 = vmul.f32 %v2762_v34, %v3714_v40 }
 0x80c   :  { %v1589_v22 = vpop.f32.mrf.mxu1 }
 0x80d   :  { %v3831_v11 = vmul.f32 %v1589_v22, %v3756_v8  ;;  %v3846_v8 = vmul.f32 %v1576_v52, %v3739_v53  ;;  %v1609_v53 = vmul.f32 %v1560_v54, %v3718_v1  ;;  %v1608_v52 = vmul.f32 %v1557_v2, %v3716_v58 }
 0x80e   :  { %v2774_v49 = vpop.f32.mrf.mxu1 }
 0x80f   :  { %v3823_v30 = vmul.f32 %v2774_v49, %v3772_v14  ;;  %v3840_v14 = vmul.f32 %v2769_v50, %v3750_v6  ;;  %v1624_v6 = vpack.c.bf16 %v3846_v8, %v3849_v15  ;;  %v1610_v50 = vmul.f32 %v2765_v4, %v3729_v7 }
 0x810   :  { %v1592_v24 = vpop.f32.mrf.mxu1  ;;  %v1622_v3 = vpack.c.bf16 %v1609_v53, %v1608_v52  ;;  %v1621_v7 = vpack.c.bf16 %v1607_v51, %v1606_v19  ;;  %v1605_v4 = vmul.f32 %v1544_v10, %v3705_v29 }
 0x811   :  { %v1627_v0 = vpack.c.bf16 %v3823_v30, %v3820_v55  ;;  %v3828_v17 = vmul.f32 %v1592_v24, %v3759_v56  ;;  %v1625_v56 = vpack.c.bf16 %v3835_v28, %v3840_v14  ;;  %v1623_v20 = vpack.c.bf16 %v1611_v36, %v1610_v50 }
 0x812   :  { %v1620_v58 = vpack.c.bf16 %v1605_v4, %v1604_v26 }
 0x813   :  { %2776 = vmatpush3.bf16.msra.mxu0 %v1627_v0  ;;  %v1626_v18 = vpack.c.bf16 %v3828_v17, %v3831_v11 }
 0x814   :  { %2777 = vmatprep.subr.bf16.mxu0 %v4183_v43 }
 0x817   :  { %2778 = vmatpush3.bf16.msra.mxu0 %v1626_v18 }
 0x818   :  { %2779 = vmatprep.subr.bf16.mxu0 %v4183_v43 }
 0x81b   :  { %2780 = vmatpush3.bf16.msra.mxu0 %v1625_v56 }
 0x81c   :  { %2781 = vmatprep.subr.bf16.mxu0 %v4183_v43 }
 0x81f   :  { %2782 = vmatpush3.bf16.msra.mxu0 %v1624_v6 }
 0x820   :  { %2783 = vmatprep.subr.bf16.mxu0 %v4183_v43 }
 0x823   :  { %2784 = vmatpush3.bf16.msra.mxu0 %v1623_v20 }
 0x824   :  { %2785 = vmatprep.subr.bf16.mxu0 %v4183_v43 }
 0x827   :  { %2786 = vmatpush3.bf16.msra.mxu0 %v1622_v3 }
 0x828   :  { %2787 = vmatprep.subr.bf16.mxu0 %v4183_v43 }
 0x82b   :  { %2788 = vmatpush3.bf16.msra.mxu0 %v1621_v7 }
 0x82c   :  { %2789 = vmatprep.subr.bf16.mxu0 %v4183_v43 }
 0x82f   :  { %2790 = vmatpush3.bf16.msra.mxu0 %v1620_v58 }
 0x830   :  { %2887 = vmatprep.subr.msk.bf16.mxu0 %vm599_vm2, %v3455_v41 }
 0x832   :  { %2792 = vmatmul.mubr.msk.bf16.vlgmr.msra.gmra.mxu0 %vm3406_vm3, %v4184_v9 }
 0x833   :  { %2818 = vmatpush3.bf16.msra.mxu0 %v3459_v42 }
 0x834   :  { %2855 = vmatprep.subr.bf16.mxu0 %v4183_v43 }
 0x8f2   :  { %v1662_v48 = vpop.f32.mrf.mxu0 }
 0x8f3   :  { %v1663_v29 = vadd.f32 1e-06, %v1662_v48 }
 0x8f4   :  { %v2793_v40 = vpop.f32.mrf.mxu0 }
 0x8f5   :  { %3011 = vrcp.f32 %v1663_v29 }
 0x8f6   :  { %v1665_v33 = vpop.f32.mrf.mxu0 }
 0x8f8   :  { %v2794_v1 = vpop.f32.mrf.mxu0 }
 0x902   :  { %v3012_v32 = vpop.eup %3011 }
 0x903   :  { %v1669_v39 = vmul.f32 %v3012_v32, %v3695_v12 }
 0x905   :  { %v1671_v34 = vcombine.high %v1669_v39, %v1669_v39  ;;  %v1678_v41 = vrot.slane %v1669_v39, %v3468_v16 }
 0x907   :  { %v1686_v10 = vcombine.high %v1678_v41, %v1678_v41  ;;  %v1694_v2 = vrot.slane %v1678_v41, %v3468_v16  ;;  %v1685_v54 = vrot.slane %v1671_v34, %v3468_v16 }
 0x909   :  { %v1708_v42 = vrot.slane %v1686_v10, %v3468_v16  ;;  %v1723_v22 = vrot.slane %v1694_v2, %v3472_v37  ;;  %v1716_v49 = vcombine.high %v1694_v2, %v1694_v2  ;;  %v1701_v20 = vrot.slane %v1685_v54, %v3468_v16 }
 0x90a   :  { %v1687_v40 = vcombine.high %v1685_v54, %v1685_v54 }
 0x90b   :  { %v3879_v24 = vmul.f32 %v1723_v22, %v1604_v26  ;;  %v3881_v0 = vmul.f32 %v1723_v22, %v1605_v4  ;;  %v1727_v18 = vrot.slane %v1708_v42, %v3472_v37  ;;  %v1731_v56 = vrot.slane %v1716_v49, %v3472_v37 }
 0x90c   :  { %v1718_v6 = vcombine.high %v1708_v42, %v1708_v42  ;;  %v1717_v39 = vcombine.high %v1701_v20, %v1701_v20 }
 0x90d   :  { %v1776_v3 = vpack.c.bf16 %v3881_v0, %v3879_v24  ;;  %v3888_v7 = vmul.f32 %v1727_v18, %v1606_v19  ;;  %v3890_v58 = vmul.f32 %v1727_v18, %v1607_v51  ;;  %v3892_v48 = vmul.f32 %v1731_v56, %v1608_v52 }
 0x90e   :  { %v3894_v26 = vmul.f32 %v1731_v56, %v1609_v53  ;;  %v1735_v29 = vrot.slane %v1718_v6, %v3472_v37  ;;  %v1739_v19 = vrot.slane %v1701_v20, %v3472_v37  ;;  %v1715_v51 = vrot.slane %v1687_v40, %v3468_v16 }
 0x90f   :  { %2801 = vmatprep.mubr.msk.bf16.mxu1 %vm549_vm12, %v1776_v3  ;;  %v1777_v4 = vpack.c.bf16 %v3890_v58, %v3888_v7 }
 0x910   :  { %v1778_v33 = vpack.c.bf16 %v3894_v26, %v3892_v48  ;;  %v3905_v52 = vmul.f32 %v1735_v29, %v1610_v50  ;;  %v3907_v53 = vmul.f32 %v1735_v29, %v1611_v36  ;;  %v3911_v1 = vmul.f32 %v1739_v19, %v3849_v15 }
 0x911   :  { %2802 = vmatmul.mubr.msk.bf16.vlgmr.msra.gmra.mxu1 %vm549_vm12, %v1777_v4  ;;  %v3914_v32 = vmul.f32 %v1739_v19, %v3846_v8  ;;  %v1743_v41 = vrot.slane %v1715_v51, %v3472_v37  ;;  %v1747_v36 = vrot.slane %v1717_v39, %v3472_v37  ;;  %v1719_v10 = vcombine.high %v1715_v51, %v1715_v51 }
 0x912   :  { %2805 = vmatprep.mubr.msk.bf16.mxu1 %vm549_vm12, %v1778_v33  ;;  %v1779_v34 = vpack.c.bf16 %v3907_v53, %v3905_v52 }
 0x913   :  { %v1780_v50 = vpack.c.bf16 %v3914_v32, %v3911_v1  ;;  %v3925_v15 = vmul.f32 %v1743_v41, %v3840_v14  ;;  %v3928_v8 = vmul.f32 %v1743_v41, %v3835_v28  ;;  %v3931_v2 = vmul.f32 %v1747_v36, %v3831_v11 }
 0x914   :  { %v3934_v54 = vmul.f32 %v1747_v36, %v3828_v17  ;;  %v1751_v22 = vrot.slane %v1719_v10, %v3472_v37 }
 0x915   :  { %v1781_v42 = vpack.c.bf16 %v3928_v8, %v3925_v15 }
 0x916   :  { %v1782_v49 = vpack.c.bf16 %v3934_v54, %v3931_v2  ;;  %v3944_v28 = vmul.f32 %v1751_v22, %v3820_v55  ;;  %v3947_v11 = vmul.f32 %v1751_v22, %v3823_v30 }
 0x918   :  { %v1783_v17 = vpack.c.bf16 %v3947_v11, %v3944_v28 }
 0x919   :  { %2806 = vmatmul.mubr.msk.bf16.gmra.mxu1 %vm549_vm12, %v1779_v34 }
 0x91a   :  { %2809 = vmatprep.mubr.msk.bf16.mxu1 %vm549_vm12, %v1780_v50 }
 0x921   :  { %2810 = vmatmul.mubr.msk.bf16.gmra.mxu1 %vm549_vm12, %v1781_v42 }
 0x922   :  { %2813 = vmatprep.mubr.msk.bf16.mxu1 %vm549_vm12, %v1782_v49 }
 0x929   :  { %2814 = vmatmul.mubr.msk.bf16.gmra.mxu1 %vm549_vm12, %v1783_v17 }
 0x92a   :  { %2851 = vmatprep.mubr.msk.bf16.mxu1 %vm3049_vm0, %v4183_v43 }
 0x9d1   :  { %v2803_v14 = vpop.f32.mrf.mxu1 }
 0x9d2   :  { %v1851_v6 = vadd.f32 1e-06, %v2803_v14 }
 0x9d3   :  { %v1842_v18 = vpop.f32.mrf.mxu1 }
 0x9d4   :  { %v1843_v56 = vadd.f32 1e-06, %v1842_v18 }
 0x9d5   :  { %v2804_v20 = vpop.f32.mrf.mxu1 }
 0x9d6   :  { %v1854_v3 = vadd.f32 1e-06, %v2804_v20  ;;  %3013 = vrcp.f32 %v1843_v56 }
 0x9d7   :  { %v1845_v55 = vpop.f32.mrf.mxu1 }
 0x9d8   :  { %3015 = vrcp.f32 %v1854_v3  ;;  %v1846_v4 = vadd.f32 1e-06, %v1845_v55 }
 0x9d9   :  { %3017 = vrcp.f32 %v1851_v6  ;;  %v2807_v30 = vpop.f32.mrf.mxu1 }
 0x9da   :  { %3019 = vrcp.f32 %v1846_v4  ;;  %v1867_v33 = vadd.f32 1e-06, %v2807_v30 }
 0x9db   :  { %v1858_v29 = vpop.f32.mrf.mxu1 }
 0x9dc   :  { %v1859_v40 = vadd.f32 1e-06, %v1858_v29 }
 0x9dd   :  { %v2808_v19 = vpop.f32.mrf.mxu1 }
 0x9de   :  { %v1870_v51 = vadd.f32 1e-06, %v2808_v19  ;;  %3021 = vrcp.f32 %v1859_v40 }
 0x9df   :  { %v1861_v39 = vpop.f32.mrf.mxu1 }
 0x9e0   :  { %3023 = vrcp.f32 %v1870_v51  ;;  %v1862_v34 = vadd.f32 1e-06, %v1861_v39 }
 0x9e1   :  { %3025 = vrcp.f32 %v1867_v33  ;;  %v2811_v41 = vpop.f32.mrf.mxu1 }
 0x9e2   :  { %3027 = vrcp.f32 %v1862_v34  ;;  %v1883_v22 = vadd.f32 1e-06, %v2811_v41 }
 0x9e3   :  { %v1874_v50 = vpop.f32.mrf.mxu1  ;;  %v3014_v36 = vpop.eup %3013 }
 0x9e4   :  { %v1875_v10 = vadd.f32 1e-06, %v1874_v50  ;;  %v1921_v3 = vmul.f32 %v3014_v36, %v3577_v21 }
 0x9e5   :  { %v3016_v42 = vpop.eup %3015  ;;  %v2812_v49 = vpop.f32.mrf.mxu1 }
 0x9e6   :  { %v3018_v17 = vpop.eup %3017  ;;  %v1886_v14 = vadd.f32 1e-06, %v2812_v49  ;;  %3029 = vrcp.f32 %v1875_v10  ;;  %v1924_v6 = vmul.f32 %v3016_v42, %v3579_v44 }
 0x9e7   :  { %v3020_v18 = vpop.eup %3019  ;;  %v1877_v56 = vpop.f32.mrf.mxu1  ;;  %v1923_v30 = vmul.f32 %v3018_v17, %v3581_v35 }
 0x9e8   :  { %3031 = vrcp.f32 %v1886_v14  ;;  %v1878_v20 = vadd.f32 1e-06, %v1877_v56  ;;  %v1922_v55 = vmul.f32 %v3020_v18, %v3575_v23 }
 0x9e9   :  { %3033 = vrcp.f32 %v1883_v22  ;;  %v2815_v4 = vpop.f32.mrf.mxu1  ;;  %v1938_v33 = vpack.c.bf16 %v1924_v6, %v1923_v30 }
 0x9ea   :  { %3035 = vrcp.f32 %v1878_v20  ;;  %v1937_v29 = vpack.c.bf16 %v1922_v55, %v1921_v3  ;;  %v1899_v44 = vadd.f32 1e-06, %v2815_v4 }
 0x9eb   :  { %v1890_v40 = vpop.f32.mrf.mxu1  ;;  %v3022_v19 = vpop.eup %3021 }
 0x9ec   :  { %v1891_v51 = vadd.f32 1e-06, %v1890_v40  ;;  %2819 = vmatprep.mubr.msk.bf16.mxu0 %vm595_vm4, %v1937_v29  ;;  %v1925_v10 = vmul.f32 %v3022_v19, %v3585_v47 }
 0x9ed   :  { %v3024_v39 = vpop.eup %3023  ;;  %v2816_v34 = vpop.f32.mrf.mxu1  ;;  %2820 = vmatmul.mubr.msk.bf16.vlgmr.msra.gmra.mxu0 %vm595_vm4, %v1938_v33 }
 0x9ee   :  { %v3026_v21 = vpop.eup %3025  ;;  %v1902_v41 = vadd.f32 1e-06, %v2816_v34  ;;  %3037 = vrcp.f32 %v1891_v51  ;;  %v1928_v35 = vmul.f32 %v3024_v39, %v3587_v13 }
 0x9ef   :  { %v3028_v23 = vpop.eup %3027  ;;  %v1893_v50 = vpop.f32.mrf.mxu1  ;;  %v1927_v22 = vmul.f32 %v3026_v21, %v3590_v31 }
 0x9f0   :  { %3039 = vrcp.f32 %v1902_v41  ;;  %v1894_v36 = vadd.f32 1e-06, %v1893_v50  ;;  %v1926_v42 = vmul.f32 %v3028_v23, %v3583_v46 }
 0x9f1   :  { %3041 = vrcp.f32 %v1899_v44  ;;  %v1940_v17 = vpack.c.bf16 %v1928_v35, %v1927_v22 }
 0x9f2   :  { %3043 = vrcp.f32 %v1894_v36  ;;  %v1939_v49 = vpack.c.bf16 %v1926_v42, %v1925_v10 }
 0x9f3   :  { %v3030_v14 = vpop.eup %3029 }
 0x9f4   :  { %2823 = vmatprep.mubr.msk.bf16.mxu0 %vm595_vm4, %v1939_v49  ;;  %v1929_v47 = vmul.f32 %v3030_v14, %v3599_v57 }
 0x9f5   :  { %v3032_v18 = vpop.eup %3031  ;;  %2824 = vmatmul.mubr.msk.bf16.gmra.mxu0 %vm595_vm4, %v1940_v17 }
 0x9f6   :  { %v3034_v56 = vpop.eup %3033  ;;  %v1932_v6 = vmul.f32 %v3032_v18, %v3605_v45 }
 0x9f7   :  { %v3036_v13 = vpop.eup %3035  ;;  %v1931_v20 = vmul.f32 %v3034_v56, %v3607_v62 }
 0x9f8   :  { %v1930_v46 = vmul.f32 %v3036_v13, %v3595_v63 }
 0x9f9   :  { %v1942_v3 = vpack.c.bf16 %v1932_v6, %v1931_v20 }
 0x9fa   :  { %v1941_v31 = vpack.c.bf16 %v1930_v46, %v1929_v47 }
 0x9fb   :  { %v3038_v55 = vpop.eup %3037 }
 0x9fc   :  { %2827 = vmatprep.mubr.msk.bf16.mxu0 %vm595_vm4, %v1941_v31  ;;  %v1933_v45 = vmul.f32 %v3038_v55, %v3617_v60 }
 0x9fd   :  { %v3040_v4 = vpop.eup %3039  ;;  %2828 = vmatmul.mubr.msk.bf16.gmra.mxu0 %vm595_vm4, %v1942_v3 }
 0x9fe   :  { %v3042_v30 = vpop.eup %3041  ;;  %v1936_v40 = vmul.f32 %v3040_v4, %v3621_v38 }
 0x9ff   :  { %v3044_v29 = vpop.eup %3043  ;;  %v1935_v63 = vmul.f32 %v3042_v30, %v3624_v5 }
 0xa00   :  { %v1934_v57 = vmul.f32 %v3044_v29, %v3612_v27 }
 0xa01   :  { %v1944_v62 = vpack.c.bf16 %v1936_v40, %v1935_v63 }
 0xa02   :  { %v1943_v33 = vpack.c.bf16 %v1934_v57, %v1933_v45 }
 0xa04   :  { %2831 = vmatprep.mubr.msk.bf16.mxu0 %vm595_vm4, %v1943_v33 }
 0xa05   :  { %2832 = vmatmul.mubr.msk.bf16.gmra.mxu0 %vm595_vm4, %v1944_v62 }
 0xa06   :  { %2871 = vmatprep.mubr.msk.bf16.mxu0 %vm3049_vm0, %v4183_v43 }
 0xaad   :  { %v2821_v19 = vpop.f32.mrf.mxu0 }
 0xaae   :  { %v4037_v47 = vmul.f32 %v2821_v19, %v3888_v7 }
 0xaaf   :  { %v2003_v51 = vpop.f32.mrf.mxu0 }
 0xab0   :  { %v4046_v46 = vmul.f32 %v2003_v51, %v3879_v24 }
 0xab1   :  { %v2822_v39 = vpop.f32.mrf.mxu0 }
 0xab3   :  { %v2006_v44 = vpop.f32.mrf.mxu0 }
 0xab5   :  { %v2825_v38 = vpop.f32.mrf.mxu0 }
 0xab6   :  { %v4019_v13 = vmul.f32 %v2825_v38, %v3905_v52 }
 0xab7   :  { %v2019_v34 = vpop.f32.mrf.mxu0 }
 0xab8   :  { %v4028_v6 = vmul.f32 %v2019_v34, %v3892_v48  ;;  %v4043_v48 = vmul.f32 %v2006_v44, %v3881_v0 }
 0xab9   :  { %v2826_v60 = vpop.f32.mrf.mxu0 }
 0xabb   :  { %v2022_v21 = vpop.f32.mrf.mxu0 }
 0xabd   :  { %v2829_v27 = vpop.f32.mrf.mxu0 }
 0xabf   :  { %v2035_v41 = vpop.f32.mrf.mxu0 }
 0xac0   :  { %v4010_v56 = vmul.f32 %v2035_v41, %v3911_v1  ;;  %v4025_v1 = vmul.f32 %v2022_v21, %v3894_v26 }
 0xac1   :  { %v2830_v5 = vpop.f32.mrf.mxu0 }
 0xac2   :  { %v3996_v18 = vmul.f32 %v2830_v5, %v3928_v8  ;;  %v4014_v8 = vmul.f32 %v2826_v60, %v3907_v53  ;;  %v4032_v53 = vmul.f32 %v2822_v39, %v3890_v58  ;;  %v2084_v52 = vpack.c.bf16 %v4025_v1, %v4028_v6  ;;  %v4186_v60 = vld [vmem:[#allocation14_spill] sm:$0xff] }
 0xac3   :  { %v2038_v23 = vpop.f32.mrf.mxu0  ;;  %v2082_v58 = vpack.c.bf16 %v4043_v48, %v4046_v46 }
 0xac4   :  { %v2083_v26 = vpack.c.bf16 %v4032_v53, %v4037_v47 }
 0xac5   :  { %v2833_v50 = vpop.f32.mrf.mxu0 }
 0xac6   :  { %v3981_v10 = vmul.f32 %v2833_v50, %v3944_v28 }
 0xac7   :  { %v2051_v35 = vpop.f32.mrf.mxu0 }
 0xac8   :  { %v3992_v14 = vmul.f32 %v2051_v35, %v3931_v2  ;;  %v4007_v2 = vmul.f32 %v2038_v23, %v3914_v32  ;;  %v2085_v32 = vpack.c.bf16 %v4014_v8, %v4019_v13 }
 0xac9   :  { %v2834_v36 = vpop.f32.mrf.mxu0 }
 0xaca   :  { %v3984_v42 = vmul.f32 %v2834_v36, %v3947_v11  ;;  %v4001_v11 = vmul.f32 %v2829_v27, %v3925_v15  ;;  %v2086_v15 = vpack.c.bf16 %v4007_v2, %v4010_v56  ;;  %v4187_v27 = vld [vmem:[#allocation16_spill] sm:$0xff] }
 0xacb   :  { %v2054_v22 = vpop.f32.mrf.mxu0 }
 0xacc   :  { %v2089_v49 = vpack.c.bf16 %v3984_v42, %v3981_v10  ;;  %v3989_v17 = vmul.f32 %v2054_v22, %v3934_v54  ;;  %v2087_v54 = vpack.c.bf16 %v3996_v18, %v4001_v11  ;;  %v4188_v22 = vld [vmem:[#allocation15_spill] sm:$0xff] }
 0xace   :  { %2836 = vmatpush3.bf16.msra.mxu1 %v2089_v49  ;;  %v2088_v28 = vpack.c.bf16 %v3989_v17, %v3992_v14  ;;  %v4189_v49 = vld [vmem:[#allocation17_spill] sm:$0xff] }
 0xacf   :  { %2837 = vmatprep.subr.bf16.mxu1 %v4183_v43 }
 0xad2   :  { %2838 = vmatpush3.bf16.msra.mxu1 %v2088_v28 }
 0xad3   :  { %2839 = vmatprep.subr.bf16.mxu1 %v4183_v43 }
 0xad6   :  { %2840 = vmatpush3.bf16.msra.mxu1 %v2087_v54 }
 0xad7   :  { %2841 = vmatprep.subr.bf16.mxu1 %v4183_v43 }
 0xada   :  { %2842 = vmatpush3.bf16.msra.mxu1 %v2086_v15  ;;  %v4190_v15 = vld [vmem:[#allocation10_spill] sm:$0xff] }
 0xadb   :  { %2843 = vmatprep.subr.bf16.mxu1 %v4183_v43 }
 0xade   :  { %2844 = vmatpush3.bf16.msra.mxu1 %v2085_v32 }
 0xadf   :  { %2845 = vmatprep.subr.bf16.mxu1 %v4183_v43 }
 0xae2   :  { %2846 = vmatpush3.bf16.msra.mxu1 %v2084_v52  ;;  %v4191_v52 = vld [vmem:[#allocation12_spill] sm:$0xff] }
 0xae3   :  { %2847 = vmatprep.subr.bf16.mxu1 %v4183_v43 }
 0xae6   :  { %2848 = vmatpush3.bf16.msra.mxu1 %v2083_v26 }
 0xae7   :  { %2849 = vmatprep.subr.bf16.mxu1 %v4183_v43 }
 0xaea   :  { %2850 = vmatpush3.bf16.msra.mxu1 %v2082_v58  ;;  %v4192_v58 = vld [vmem:[#allocation11_spill] sm:$0xff] }
 0xaeb   :  { %2875 = vmatprep.subr.bf16.mxu1 %v4183_v43 }
 0xaed   :  { %2852 = vmatmul.mubr.msk.bf16.vlgmr.msra.gmra.mxu1 %vm3406_vm3, %v4184_v9 }
 0xaee   :  { %2876 = vmatpush3.bf16.msk.msra.mxu1 %vm3256_vm11, %v4184_v9  ;;  %2881 = vmatprep.mubr.msk.bf16.mxu1 %vm3049_vm0, %v4183_v43 }
 0xaef   :  { %2877 = vmatprep.subr.bf16.mxu1 %v4183_v43 }
 0xaf2   :  { %2878 = vmatpush3.bf16.msk.msra.mxu1 %vm3266_vm14, %v4184_v9 }
 0xaf3   :  { %2879 = vmatprep.subr.bf16.mxu1 %v4183_v43 }
 0xaf6   :  { %2880 = vmatpush3.bf16.msk.msra.mxu1 %vm3431_vm10, %v4184_v9 }
 0xbad   :  { %v2124_v0 = vpop.f32.mrf.mxu1 }
 0xbae   :  { %v2125_v7 = vadd.f32 1e-06, %v2124_v0 }
 0xbaf   :  { %v2853_v20 = vpop.f32.mrf.mxu1 }
 0xbb0   :  { %3045 = vrcp.f32 %v2125_v7  ;;  %v4193_v7 = vld [vmem:[#allocation13_spill] sm:$0xff] }
 0xbb1   :  { %v2127_v59 = vpop.f32.mrf.mxu1 }
 0xbb3   :  { %v2854_v31 = vpop.f32.mrf.mxu1 }
 0xbbd   :  { %v3046_v3 = vpop.eup %3045 }
 0xbbe   :  { %v2131_v55 = vmul.f32 %v3046_v3, %v3695_v12 }
 0xbc0   :  { %v2133_v4 = vcombine.high %v2131_v55, %v2131_v55  ;;  %v2140_v61 = vrot.slane %v2131_v55, %v3468_v16  ;;  %v4194_v55 = vld [vmem:[#allocation6_spill] sm:$0xff] }
 0xbc2   :  { %v2147_v30 = vrot.slane %v2133_v4, %v3468_v16  ;;  %v2148_v63 = vcombine.high %v2140_v61, %v2140_v61  ;;  %v2156_v35 = vrot.slane %v2140_v61, %v3468_v16 }
 0xbc4   :  { %v2149_v29 = vcombine.high %v2147_v30, %v2147_v30  ;;  %v2163_v40 = vrot.slane %v2147_v30, %v3468_v16  ;;  %v2170_v12 = vrot.slane %v2148_v63, %v3468_v16  ;;  %v4195_v30 = vld [vmem:[#allocation8_spill] sm:$0xff] }
 0xbc6   :  { %v2177_v45 = vrot.slane %v2149_v29, %v3468_v16  ;;  %v2179_v57 = vcombine.high %v2163_v40, %v2163_v40  ;;  %v2201_v23 = vrot.slane %v2163_v40, %v3472_v37  ;;  %v2180_v50 = vcombine.high %v2170_v12, %v2170_v12 }
 0xbc7   :  { %v2189_v31 = vrot.slane %v2170_v12, %v3472_v37  ;;  %v4199_v12 = vld [vmem:[#allocation4_spill] sm:$0xff] }
 0xbc8   :  { %v2181_v33 = vcombine.high %v2177_v45, %v2177_v45  ;;  %v2209_v62 = vrot.slane %v2179_v57, %v3472_v37  ;;  %v2205_v51 = vrot.slane %v2177_v45, %v3472_v37  ;;  %v2231_v28 = vmul.f32 %v2201_v23, %v4007_v2  ;;  %v4197_v57 = vld [vmem:[#allocation9_spill] sm:$0xff] }
 0xbc9   :  { %v2197_v26 = vrot.slane %v2180_v50, %v3472_v37 }
 0xbca   :  { %v2213_v19 = vrot.slane %v2181_v33, %v3472_v37  ;;  %v2234_v38 = vmul.f32 %v2209_v62, %v3992_v14  ;;  %v2235_v34 = vmul.f32 %v2209_v62, %v3989_v17  ;;  %v2232_v5 = vmul.f32 %v2205_v51, %v4001_v11 }
 0xbcb   :  { %v2233_v14 = vmul.f32 %v2205_v51, %v3996_v18  ;;  %v2230_v17 = vmul.f32 %v2201_v23, %v4010_v56  ;;  %v2178_v11 = vcombine.high %v2156_v35, %v2156_v35  ;;  %v2247_v56 = vmul.f32 %v2231_v28, %v4193_v7 }
 0xbcc   :  { %v2236_v39 = vmul.f32 %v2213_v19, %v3981_v10  ;;  %v2237_v44 = vmul.f32 %v2213_v19, %v3984_v42  ;;  %v2250_v10 = vmul.f32 %v2234_v38, %v4188_v22  ;;  %v2251_v42 = vmul.f32 %v2235_v34, %v4189_v49  ;;  %v4198_v19 = vld [vmem:[#allocation2_spill] sm:$0xff]  ;;  %v4200_v38 = vld [vmem:[#allocation3_spill] sm:$0xff]  ;;  %v4201_v34 = vld [vmem:[#allocation5_spill] sm:$0xff] }
 0xbcd   :  { %v2248_v32 = vmul.f32 %v4190_v15, %v2232_v5  ;;  %v2249_v16 = vmul.f32 %v4191_v52, %v2233_v14  ;;  %v2246_v18 = vmul.f32 %v2230_v17, %v4192_v58  ;;  %v2193_v24 = vrot.slane %v2178_v11, %v3472_v37 }
 0xbce   :  { %v2252_v21 = vmul.f32 %v4186_v60, %v2236_v39  ;;  %v2253_v41 = vmul.f32 %v4187_v27, %v2237_v44  ;;  %v2260_v54 = vpack.c.bf16 %v2251_v42, %v2250_v10  ;;  %v2228_v2 = vmul.f32 %v2197_v26, %v4019_v13  ;;  %v4196_v13 = vld [vmem:[#allocation7_spill] sm:$0xff] }
 0xbcf   :  { %v2259_v0 = vpack.c.bf16 %v2249_v16, %v2248_v32  ;;  %v2229_v20 = vmul.f32 %v2197_v26, %v4014_v8  ;;  %v2226_v59 = vmul.f32 %v2193_v24, %v4028_v6  ;;  %v2258_v3 = vpack.c.bf16 %v2247_v56, %v2246_v18 }
 0xbd0   :  { %v2261_v36 = vpack.c.bf16 %v2253_v41, %v2252_v21  ;;  %v2244_v4 = vmul.f32 %v4194_v55, %v2228_v2  ;;  %v2227_v29 = vmul.f32 %v2193_v24, %v4025_v1  ;;  %v2185_v8 = vrot.slane %v2156_v35, %v3472_v37 }
 0xbd1   :  { %v2245_v61 = vmul.f32 %v4195_v30, %v2229_v20  ;;  %v2242_v40 = vmul.f32 %v2226_v59, %v4196_v13  ;;  %v2224_v6 = vmul.f32 %v2189_v31, %v4037_v47  ;;  %v2225_v33 = vmul.f32 %v2189_v31, %v4032_v53 }
 0xbd2   :  { %2856 = vmatpush3.bf16.msra.mxu0 %v2261_v36  ;;  %v2243_v63 = vmul.f32 %v2227_v29, %v4197_v57  ;;  %v2222_v62 = vmul.f32 %v2185_v8, %v4046_v46  ;;  %v2223_v44 = vmul.f32 %v2185_v8, %v4043_v48 }
 0xbd3   :  { %2857 = vmatprep.subr.bf16.mxu0 %v4183_v43  ;;  %v2257_v45 = vpack.c.bf16 %v2245_v61, %v2244_v4  ;;  %v2240_v51 = vmul.f32 %v4198_v19, %v2224_v6  ;;  %v2241_v39 = vmul.f32 %v4199_v12, %v2225_v33 }
 0xbd4   :  { %v2256_v1 = vpack.c.bf16 %v2243_v63, %v2242_v40  ;;  %v2238_v47 = vmul.f32 %v2222_v62, %v4200_v38  ;;  %v2239_v53 = vmul.f32 %v2223_v44, %v4201_v34 }
 0xbd5   :  { %v2255_v37 = vpack.c.bf16 %v2241_v39, %v2240_v51 }
 0xbd6   :  { %2858 = vmatpush3.bf16.msra.mxu0 %v2260_v54  ;;  %v2254_v60 = vpack.c.bf16 %v2239_v53, %v2238_v47 }
 0xbd7   :  { %2859 = vmatprep.subr.bf16.mxu0 %v4183_v43 }
 0xbda   :  { %2860 = vmatpush3.bf16.msra.mxu0 %v2259_v0 }
 0xbdb   :  { %2861 = vmatprep.subr.bf16.mxu0 %v4183_v43 }
 0xbde   :  { %2862 = vmatpush3.bf16.msra.mxu0 %v2258_v3 }
 0xbdf   :  { %2863 = vmatprep.subr.bf16.mxu0 %v4183_v43 }
 0xbe2   :  { %2864 = vmatpush3.bf16.msra.mxu0 %v2257_v45 }
 0xbe3   :  { %2865 = vmatprep.subr.bf16.mxu0 %v4183_v43 }
 0xbe6   :  { %2866 = vmatpush3.bf16.msra.mxu0 %v2256_v1 }
 0xbe7   :  { %2867 = vmatprep.subr.bf16.mxu0 %v4183_v43 }
 0xbea   :  { %2868 = vmatpush3.bf16.msra.mxu0 %v2255_v37 }
 0xbeb   :  { %2869 = vmatprep.subr.bf16.mxu0 %v4183_v43 }
 0xbee   :  { %2870 = vmatpush3.bf16.msra.mxu0 %v2254_v60 }
 0xbf1   :  { %2872 = vmatmul.mubr.msk.bf16.vlgmr.msra.gmra.mxu0 %vm3406_vm3, %v4184_v9 }
 0xcb1   :  { %v2296_v46 = vpop.f32.mrf.mxu0 }
 0xcb2   :  { %v2302_v21 = vpack.c.bf16 %v2296_v46, %v2296_v46 }
 0xcb3   :  { %v2873_v48 = vpop.f32.mrf.mxu0 }
 0xcb4   :  { %2882 = vmatmul.mubr.msk.bf16.vlgmr.msra.gmra.mxu1 %vm549_vm12, %v2302_v21 }
 0xcb5   :  { %v2299_v27 = vpop.f32.mrf.mxu0 }
 0xcb7   :  { %v2874_v41 = vpop.f32.mrf.mxu0 }
 0xd74   :  { %v2340_v5 = vpop.f32.mrf.mxu1 }
 0xd75   :  { %2346 = vst.msk [vmem:[%s4136_s6] sm:$0xff] %vm595_vm4, %v2340_v5 }
 0xd76   :  { %v2883_v43 = vpop.f32.mrf.mxu1 }
 0xd78   :  { %v2343_v23 = vpop.f32.mrf.mxu1 }
 0xd7a   :  { %v2884_v50 = vpop.f32.mrf.mxu1 }

</bundles_post_ra>
